<compile_context>
chip_gen: v6e
topology: v6e:2x2x1
jax: 0.10.0
libtpu: 0.0.40
codegen_flags: <defaults>
</compile_context>

<pallas_src>
import functools

import jax
import jax.numpy as jnp
from jax.experimental import pallas as pl
from jax.experimental.pallas import tpu as pltpu

EPS = 1e-5
NEG_SLOPE = 0.2


def _round_up(a, b):
    return (a + b - 1) // b * b


def _leaky_relu(x):
    # max(x, 0.2x) == LeakyReLU(0.2) for 0 < slope < 1.
    return jnp.maximum(x, NEG_SLOPE * x)


def _gn_single(h, gamma, beta):
    """GroupNorm with a single group on h:[T,C] (f32, biased variance, per-row stats)."""
    mean = jnp.mean(h, axis=-1, keepdims=True)
    var = jnp.maximum(jnp.mean(h * h, axis=-1, keepdims=True) - mean * mean, 0.0)
    return (h - mean) * (jax.lax.rsqrt(var + EPS) * gamma) + beta


def _gn_grouped(h, beta, m2, mt2g):
    """Grouped GroupNorm on h:[T,C] via fused block-diagonal matmuls (all f32).

    m2   : (2C, 2G) = block_diag(m, m), m the one-hot channel->group matrix.
    mt2g : (2G, 2C) = block_diag(m.T * gamma, m.T)  (gamma folded into the scale block).
    One stat matmul yields [sum_g | sumsq_g]; one expansion matmul yields
    [scale_c (incl. gamma) | mean_c].  rsqrt is evaluated at group granularity (T,G) only.
    """
    c = h.shape[1]
    g = m2.shape[1] // 2
    inv_gs = 1.0 / (c // g)

    stats = jnp.dot(jnp.concatenate([h, h * h], axis=-1), m2,
                    preferred_element_type=jnp.float32)              # (T, 2G)
    mean_g = stats[:, :g] * inv_gs
    var_g = jnp.maximum(stats[:, g:] * inv_gs - mean_g * mean_g, 0.0)
    inv_g = jax.lax.rsqrt(var_g + EPS)                               # (T, G)

    se = jnp.dot(jnp.concatenate([inv_g, mean_g], axis=-1), mt2g,
                 preferred_element_type=jnp.float32)                 # (T, 2C)
    scale_c, mean_c = se[:, :c], se[:, c:]
    return (h - mean_c) * scale_c + beta


def _block_grouped(h, w, b, beta, m2, mt2g):
    """Linear (bf16 MXU matmul, f32 accumulation) + LeakyReLU + grouped GroupNorm (f32)."""
    z = jnp.dot(h.astype(jnp.bfloat16), w, preferred_element_type=jnp.float32) + b
    return _gn_grouped(_leaky_relu(z), beta, m2, mt2g)


# ------------------------------- kernels -------------------------------


def _feature_kernel(n_valid, tile_n,
                    x_ref,
                    w1, b1, ga1, be1,
                    w2, b2, be2,
                    w3, b3, be3,
                    w4, b4, be4,
                    m2_64, mt2_g2, m2_128, mt2_g3, mt2_g4,
                    fi_ref, gmax_ref):
    # mlp1 layer 1: num_in -> 32 channels, single GN group (no fused matrices needed).
    z1 = jnp.dot(x_ref[...].astype(jnp.bfloat16), w1[...],
                 preferred_element_type=jnp.float32) + b1[...]
    f1 = _gn_single(_leaky_relu(z1), ga1[...], be1[...])
    f2 = _block_grouped(f1, w2[...], b2[...], be2[...], m2_64[...], mt2_g2[...])      # 64ch
    f_i = _block_grouped(f2, w3[...], b3[...], be3[...], m2_128[...], mt2_g3[...])    # 128ch
    h_i = _block_grouped(f_i, w4[...], b4[...], be4[...], m2_128[...], mt2_g4[...])   # 128ch

    fi_ref[...] = f_i.astype(jnp.bfloat16)

    # Per-tile max of h_i over valid rows only (zero-padded rows masked to -inf).
    row = pl.program_id(0) * tile_n + jax.lax.broadcasted_iota(jnp.int32, h_i.shape, 0)
    tile_max = jnp.max(jnp.where(row < n_valid, h_i, -jnp.inf), axis=0, keepdims=True)
    gmax_ref[...] = jnp.broadcast_to(tile_max, gmax_ref.shape)


def _head_kernel(fi_ref, gterm_ref,
                 w5a, be5,
                 w6, b6, be6,
                 w7, b7,
                 m2_64, mt2_g6, m2_128, mt2_g5,
                 out_ref):
    f_i = fi_ref[...]                                                # (T, 128) bf16
    # concat([f_i, g_bcast]) @ W5 + b5 == f_i @ W5a + (g @ W5b + b5) == f_i @ W5a + gterm.
    h5 = jnp.dot(f_i, w5a[...], preferred_element_type=jnp.float32) + gterm_ref[...]
    h5 = _gn_grouped(_leaky_relu(h5), be5[...], m2_128[...], mt2_g5[...])
    f_g = _block_grouped(h5, w6[...], b6[...], be6[...], m2_64[...], mt2_g6[...])
    # Unpadded (T, c_out) store: masked vst in-kernel, but 16x less HBM writeback.
    out_ref[...] = (jnp.dot(f_g.astype(jnp.bfloat16), w7[...],
                            preferred_element_type=jnp.float32) + b7[...])


# ------------------------------- wrapper -------------------------------


def _onehot_groups(c, g):
    gs = c // g
    return (jnp.arange(c)[:, None] // gs == jnp.arange(g)[None, :]).astype(jnp.float32)


def _block_diag(a, b):
    (ra, ca), (rb, cb) = a.shape, b.shape
    out = jnp.zeros((ra + rb, ca + cb), jnp.float32)
    return out.at[:ra, :ca].set(a).at[ra:, ca:].set(b)


def _resident(a):
    # Full-array block + constant index map: fetched once, stays VMEM-resident across steps.
    return pl.BlockSpec(a.shape, lambda i: (0, 0))


@functools.partial(jax.jit, static_argnames=("tile_n",))
def pointnet_forward(x, params, *, tile_n=None):
    n, num_in = x.shape
    c_out = params["w7"].shape[1]

    if tile_n is None:
        # Large tiles amortize the ~0.35us/grid-step overhead and keep DMAs big; aim for
        # >= 2 tiles so the "parallel" axis can feed both v7x TensorCores on small clouds.
        tile_n = min(2048, _round_up(max(-(-n // 2), 16), 16))
    tile_n = max(16, _round_up(tile_n, 16))       # 16: bf16 sublane tile for streamed f_i
    n_pad = _round_up(max(n, tile_n), tile_n)
    num_tiles = n_pad // tile_n

    # --- wrapper-side layout plumbing ---
    in_pad = max(8, _round_up(num_in, 8))         # lane-pad the tiny input-channel dim
    x_p = jnp.zeros((n_pad, in_pad), jnp.float32).at[:n, :num_in].set(x.astype(jnp.float32))

    bf = lambda a: a.astype(jnp.bfloat16)
    w1 = bf(jnp.zeros((in_pad, 32), jnp.float32).at[:num_in, :].set(params["w1"]))
    w2, w3, w4, w6, w7 = (bf(params[k]) for k in ("w2", "w3", "w4", "w6", "w7"))
    w5a = bf(params["w5"][:128, :])
    w5b = params["w5"][128:, :]                   # applied once to the (1,128) global feature

    # Fused GroupNorm matrices:  stats  via block_diag(m, m)            : (2C, 2G)
    #                            expand via block_diag(m.T*gamma, m.T)  : (2G, 2C)
    m64, m128 = _onehot_groups(64, 2), _onehot_groups(128, 4)
    m2_64, m2_128 = _block_diag(m64, m64), _block_diag(m128, m128)
    expand = lambda m, ga: _block_diag(m.T * ga, m.T)
    mt2_g2, mt2_g6 = expand(m64, params["ga2"]), expand(m64, params["ga6"])
    mt2_g3, mt2_g4, mt2_g5 = (expand(m128, params[k]) for k in ("ga3", "ga4", "ga5"))

    cparams = pltpu.CompilerParams(dimension_semantics=("parallel",),
                                   vmem_limit_bytes=64 * 1024 * 1024)

    # ---- phase 1: mlp1 + mlp2 per point-tile; per-tile max of h_i ----
    feat_inputs = (
        x_p,
        w1, params["b1"], params["ga1"], params["be1"],
        w2, params["b2"], params["be2"],
        w3, params["b3"], params["be3"],
        w4, params["b4"], params["be4"],
        m2_64, mt2_g2, m2_128, mt2_g3, mt2_g4,
    )
    f_i, gmax = pl.pallas_call(
        functools.partial(_feature_kernel, n, tile_n),
        grid=(num_tiles,),
        in_specs=[pl.BlockSpec((tile_n, in_pad), lambda i: (i, 0))]
                 + [_resident(a) for a in feat_inputs[1:]],
        out_specs=[pl.BlockSpec((tile_n, 128), lambda i: (i, 0)),
                   pl.BlockSpec((8, 128), lambda i: (i, 0))],
        out_shape=(jax.ShapeDtypeStruct((n_pad, 128), jnp.bfloat16),
                   jax.ShapeDtypeStruct((8 * num_tiles, 128), jnp.float32)),
        compiler_params=cparams,
    )(*feat_inputs)

    # ---- global max over points + a single (1,128)@(128,128) matmul for the broadcast
    #      global-feature contribution (tiny, done once in the wrapper) ----
    g = jnp.max(gmax, axis=0, keepdims=True)                                     # (1, 128)
    gterm = jnp.dot(g, w5b, preferred_element_type=jnp.float32) + params["b5"]   # (1, 128)

    # ---- phase 2: mlp3 + final linear per point-tile (output stored unpadded) ----
    head_inputs = (
        f_i, gterm,
        w5a, params["be5"],
        w6, params["b6"], params["be6"],
        w7, params["b7"],
        m2_64, mt2_g6, m2_128, mt2_g5,
    )
    out_p = pl.pallas_call(
        _head_kernel,
        grid=(num_tiles,),
        in_specs=[pl.BlockSpec((tile_n, 128), lambda i: (i, 0))]
                 + [_resident(a) for a in head_inputs[1:]],
        out_specs=pl.BlockSpec((tile_n, c_out), lambda i: (i, 0)),
        out_shape=jax.ShapeDtypeStruct((n_pad, c_out), jnp.float32),
        compiler_params=cparams,
    )(*head_inputs)

    return out_p[:n]


# ----------------------- parameter init (deterministic) -----------------------


def init_params(key, num_in, num_out):
    keys = iter(jax.random.split(key, 26))

    def lin(cin, cout):
        k = 1.0 / jnp.sqrt(jnp.float32(cin))
        w = jax.random.uniform(next(keys), (cin, cout), jnp.float32, -k, k)
        b = jax.random.uniform(next(keys), (1, cout), jnp.float32, -k, k)
        return w, b

    def gn(c):
        ga = 1.0 + 0.1 * jax.random.normal(next(keys), (1, c), jnp.float32)
        be = 0.1 * jax.random.normal(next(keys), (1, c), jnp.float32)
        return ga, be

    p = {}
    p["w1"], p["b1"] = lin(num_in, 32);   p["ga1"], p["be1"] = gn(32)
    p["w2"], p["b2"] = lin(32, 64);       p["ga2"], p["be2"] = gn(64)
    p["w3"], p["b3"] = lin(64, 128);      p["ga3"], p["be3"] = gn(128)
    p["w4"], p["b4"] = lin(128, 128);     p["ga4"], p["be4"] = gn(128)
    p["w5"], p["b5"] = lin(256, 128);     p["ga5"], p["be5"] = gn(128)
    p["w6"], p["b6"] = lin(128, 64);      p["ga6"], p["be6"] = gn(64)
    p["w7"], p["b7"] = lin(64, num_out)
    return p


# ----------------------- pure-JAX reference (PyTorch semantics) -----------------------


def _ref_gn(h, ga, be, groups):
    n, c = h.shape
    hh = h.reshape(n, groups, c // groups)
    mean = hh.mean(axis=-1, keepdims=True)
    var = hh.var(axis=-1, keepdims=True)  # biased, like torch.nn.GroupNorm
    hh = (hh - mean) / jnp.sqrt(var + EPS)
    return hh.reshape(n, c) * ga + be


def _ref_block(h, w, b, ga, be, groups):
    h = h @ w + b
    h = jnp.where(h >= 0, h, NEG_SLOPE * h)
    return _ref_gn(h, ga, be, groups)


def ref_forward(x, p):
    n = x.shape[0]
    f1 = _ref_block(x, p["w1"], p["b1"], p["ga1"], p["be1"], 1)
    f2 = _ref_block(f1, p["w2"], p["b2"], p["ga2"], p["be2"], 2)
    f_i = _ref_block(f2, p["w3"], p["b3"], p["ga3"], p["be3"], 4)
    h_i = _ref_block(f_i, p["w4"], p["b4"], p["ga4"], p["be4"], 4)
    g = jnp.max(h_i, axis=0)
    new = jnp.broadcast_to(g[None, :], (n, 128))
    concat = jnp.concatenate([f_i, new], axis=1)
    h5 = _ref_block(concat, p["w5"], p["b5"], p["ga5"], p["be5"], 4)
    f_g = _ref_block(h5, p["w6"], p["b6"], p["ga6"], p["be6"], 2)
    return f_g @ p["w7"] + p["b7"]


if __name__ == "__main__":
    key = jax.random.PRNGKey(0)
    kx, kp = jax.random.split(key)

    N, NUM_IN, NUM_OUT = 40, 3, 8           # small: 40 points, 3 input feats, 8 output feats
    x = jax.random.normal(kx, (N, NUM_IN), jnp.float32)
    params = init_params(kp, NUM_IN, NUM_OUT)
    ref = ref_forward(x, params)

    # Explicit small tile: exercises the multi-tile grid and padded-row masking of the max.
    out = jax.block_until_ready(pointnet_forward(x, params, tile_n=16))
    assert out.shape == (N, NUM_OUT), out.shape
    # bf16 layer matmuls with f32 accumulation vs. the pure-f32 reference.
    assert jnp.allclose(out, ref, rtol=1e-1, atol=1e-1), (
        f"max abs diff {float(jnp.max(jnp.abs(out - ref)))}"
    )

    # Default heuristic path (>=2 tiles for megacore; large-tile cap for big clouds).
    out2 = jax.block_until_ready(pointnet_forward(x, params))
    assert out2.shape == (N, NUM_OUT), out2.shape
    assert jnp.allclose(out2, ref, rtol=1e-1, atol=1e-1), (
        f"max abs diff {float(jnp.max(jnp.abs(out2 - ref)))}"
    )

    print("KERNEL_OK")
</pallas_src>

<mosaic_0001>
module attributes {stable_mosaic.version = 11 : i64} {
  func.func @_feature_kernel(%arg0: i32, %arg1: memref<16x8xf32, #tpu.memory_space<vmem>>, %arg2: memref<8x32xbf16, #tpu.memory_space<vmem>>, %arg3: memref<1x32xf32, #tpu.memory_space<vmem>>, %arg4: memref<1x32xf32, #tpu.memory_space<vmem>>, %arg5: memref<1x32xf32, #tpu.memory_space<vmem>>, %arg6: memref<32x64xbf16, #tpu.memory_space<vmem>>, %arg7: memref<1x64xf32, #tpu.memory_space<vmem>>, %arg8: memref<1x64xf32, #tpu.memory_space<vmem>>, %arg9: memref<64x128xbf16, #tpu.memory_space<vmem>>, %arg10: memref<1x128xf32, #tpu.memory_space<vmem>>, %arg11: memref<1x128xf32, #tpu.memory_space<vmem>>, %arg12: memref<128x128xbf16, #tpu.memory_space<vmem>>, %arg13: memref<1x128xf32, #tpu.memory_space<vmem>>, %arg14: memref<1x128xf32, #tpu.memory_space<vmem>>, %arg15: memref<128x4xf32, #tpu.memory_space<vmem>>, %arg16: memref<4x128xf32, #tpu.memory_space<vmem>>, %arg17: memref<256x8xf32, #tpu.memory_space<vmem>>, %arg18: memref<8x256xf32, #tpu.memory_space<vmem>>, %arg19: memref<8x256xf32, #tpu.memory_space<vmem>>, %arg20: memref<16x128xbf16, #tpu.memory_space<vmem>>, %arg21: memref<8x128xf32, #tpu.memory_space<vmem>>) attributes {dimension_semantics = [#tpu.dimension_semantics<parallel>], iteration_bounds = array<i64: 3>, scalar_prefetch = 0 : i64, scratch_operands = 0 : i64, tpu.core_type = #tpu.core_type<tc>, window_params = [{transform_indices = @transform_0, window_bounds = array<i64: 16, 8>}, {pipeline_mode = #tpu.pipeline_mode<synchronous>, transform_indices = @transform_1, window_bounds = array<i64: 8, 32>}, {pipeline_mode = #tpu.pipeline_mode<synchronous>, transform_indices = @transform_2, window_bounds = array<i64: 1, 32>}, {pipeline_mode = #tpu.pipeline_mode<synchronous>, transform_indices = @transform_3, window_bounds = array<i64: 1, 32>}, {pipeline_mode = #tpu.pipeline_mode<synchronous>, transform_indices = @transform_4, window_bounds = array<i64: 1, 32>}, {pipeline_mode = #tpu.pipeline_mode<synchronous>, transform_indices = @transform_5, window_bounds = array<i64: 32, 64>}, {pipeline_mode = #tpu.pipeline_mode<synchronous>, transform_indices = @transform_6, window_bounds = array<i64: 1, 64>}, {pipeline_mode = #tpu.pipeline_mode<synchronous>, transform_indices = @transform_7, window_bounds = array<i64: 1, 64>}, {pipeline_mode = #tpu.pipeline_mode<synchronous>, transform_indices = @transform_8, window_bounds = array<i64: 64, 128>}, {pipeline_mode = #tpu.pipeline_mode<synchronous>, transform_indices = @transform_9, window_bounds = array<i64: 1, 128>}, {pipeline_mode = #tpu.pipeline_mode<synchronous>, transform_indices = @transform_10, window_bounds = array<i64: 1, 128>}, {pipeline_mode = #tpu.pipeline_mode<synchronous>, transform_indices = @transform_11, window_bounds = array<i64: 128, 128>}, {pipeline_mode = #tpu.pipeline_mode<synchronous>, transform_indices = @transform_12, window_bounds = array<i64: 1, 128>}, {pipeline_mode = #tpu.pipeline_mode<synchronous>, transform_indices = @transform_13, window_bounds = array<i64: 1, 128>}, {pipeline_mode = #tpu.pipeline_mode<synchronous>, transform_indices = @transform_14, window_bounds = array<i64: 128, 4>}, {pipeline_mode = #tpu.pipeline_mode<synchronous>, transform_indices = @transform_15, window_bounds = array<i64: 4, 128>}, {pipeline_mode = #tpu.pipeline_mode<synchronous>, transform_indices = @transform_16, window_bounds = array<i64: 256, 8>}, {pipeline_mode = #tpu.pipeline_mode<synchronous>, transform_indices = @transform_17, window_bounds = array<i64: 8, 256>}, {pipeline_mode = #tpu.pipeline_mode<synchronous>, transform_indices = @transform_18, window_bounds = array<i64: 8, 256>}, {transform_indices = @transform_19, window_bounds = array<i64: 16, 128>}, {transform_indices = @transform_20, window_bounds = array<i64: 8, 128>}]} {
    %c0 = arith.constant 0 : index
    %c0_0 = arith.constant 0 : index
    %0 = vector.load %arg1[%c0, %c0_0] : memref<16x8xf32, #tpu.memory_space<vmem>>, vector<16x8xf32>
    %1 = arith.truncf %0 : vector<16x8xf32> to vector<16x8xbf16>
    %c0_1 = arith.constant 0 : index
    %c0_2 = arith.constant 0 : index
    %2 = vector.load %arg2[%c0_1, %c0_2] : memref<8x32xbf16, #tpu.memory_space<vmem>>, vector<8x32xbf16>
    %cst = arith.constant dense<0.000000e+00> : vector<16x32xf32>
    %3 = tpu.matmul %1, %2, %cst {dimension_numbers = #tpu.dot_dimension_numbers<[1], [0], [0], [1], [0, 0, 1, 1], [], []>} : vector<16x8xbf16>, vector<8x32xbf16>, vector<16x32xf32> -> vector<16x32xf32>
    %c0_3 = arith.constant 0 : index
    %c0_4 = arith.constant 0 : index
    %4 = vector.load %arg3[%c0_3, %c0_4] : memref<1x32xf32, #tpu.memory_space<vmem>>, vector<1x32xf32>
    %5 = vector.broadcast %4 : vector<1x32xf32> to vector<16x32xf32>
    %6 = arith.addf %3, %5 : vector<16x32xf32>
    %cst_5 = arith.constant 2.000000e-01 : f32
    %7 = vector.broadcast %cst_5 : f32 to vector<16x32xf32>
    %8 = arith.mulf %7, %6 : vector<16x32xf32>
    %9 = arith.maximumf %6, %8 : vector<16x32xf32>
    %c0_6 = arith.constant 0 : index
    %c0_7 = arith.constant 0 : index
    %10 = vector.load %arg4[%c0_6, %c0_7] : memref<1x32xf32, #tpu.memory_space<vmem>>, vector<1x32xf32>
    %c0_8 = arith.constant 0 : index
    %c0_9 = arith.constant 0 : index
    %11 = vector.load %arg5[%c0_8, %c0_9] : memref<1x32xf32, #tpu.memory_space<vmem>>, vector<1x32xf32>
    %cst_10 = arith.constant dense<0.000000e+00> : vector<16xf32>
    %12 = vector.multi_reduction <add>, %9, %cst_10 [1] : vector<16x32xf32> to vector<16xf32>
    %13 = vector.shape_cast %12 : vector<16xf32> to vector<16x1xf32>
    %cst_11 = arith.constant 3.200000e+01 : f32
    %14 = vector.broadcast %cst_11 : f32 to vector<16x1xf32>
    %15 = arith.divf %13, %14 : vector<16x1xf32>
    %16 = arith.mulf %9, %9 : vector<16x32xf32>
    %cst_12 = arith.constant dense<0.000000e+00> : vector<16xf32>
    %17 = vector.multi_reduction <add>, %16, %cst_12 [1] : vector<16x32xf32> to vector<16xf32>
    %18 = vector.shape_cast %17 : vector<16xf32> to vector<16x1xf32>
    %cst_13 = arith.constant 3.200000e+01 : f32
    %19 = vector.broadcast %cst_13 : f32 to vector<16x1xf32>
    %20 = arith.divf %18, %19 : vector<16x1xf32>
    %21 = arith.mulf %15, %15 : vector<16x1xf32>
    %22 = arith.subf %20, %21 : vector<16x1xf32>
    %cst_14 = arith.constant 0.000000e+00 : f32
    %23 = vector.broadcast %cst_14 : f32 to vector<16x1xf32>
    %24 = arith.maximumf %22, %23 : vector<16x1xf32>
    %25 = vector.broadcast %15 : vector<16x1xf32> to vector<16x32xf32>
    %26 = arith.subf %9, %25 : vector<16x32xf32>
    %cst_15 = arith.constant 9.99999974E-6 : f32
    %27 = vector.broadcast %cst_15 : f32 to vector<16x1xf32>
    %28 = arith.addf %24, %27 : vector<16x1xf32>
    %29 = math.rsqrt %28 : vector<16x1xf32>
    %30 = vector.broadcast %29 : vector<16x1xf32> to vector<16x32xf32>
    %31 = vector.broadcast %10 : vector<1x32xf32> to vector<16x32xf32>
    %32 = arith.mulf %30, %31 : vector<16x32xf32>
    %33 = arith.mulf %26, %32 : vector<16x32xf32>
    %34 = vector.broadcast %11 : vector<1x32xf32> to vector<16x32xf32>
    %35 = arith.addf %33, %34 : vector<16x32xf32>
    %c0_16 = arith.constant 0 : index
    %c0_17 = arith.constant 0 : index
    %36 = vector.load %arg6[%c0_16, %c0_17] : memref<32x64xbf16, #tpu.memory_space<vmem>>, vector<32x64xbf16>
    %c0_18 = arith.constant 0 : index
    %c0_19 = arith.constant 0 : index
    %37 = vector.load %arg7[%c0_18, %c0_19] : memref<1x64xf32, #tpu.memory_space<vmem>>, vector<1x64xf32>
    %c0_20 = arith.constant 0 : index
    %c0_21 = arith.constant 0 : index
    %38 = vector.load %arg8[%c0_20, %c0_21] : memref<1x64xf32, #tpu.memory_space<vmem>>, vector<1x64xf32>
    %c0_22 = arith.constant 0 : index
    %c0_23 = arith.constant 0 : index
    %39 = vector.load %arg15[%c0_22, %c0_23] : memref<128x4xf32, #tpu.memory_space<vmem>>, vector<128x4xf32>
    %c0_24 = arith.constant 0 : index
    %c0_25 = arith.constant 0 : index
    %40 = vector.load %arg16[%c0_24, %c0_25] : memref<4x128xf32, #tpu.memory_space<vmem>>, vector<4x128xf32>
    %41 = arith.truncf %35 : vector<16x32xf32> to vector<16x32xbf16>
    %cst_26 = arith.constant dense<0.000000e+00> : vector<16x64xf32>
    %42 = tpu.matmul %41, %36, %cst_26 {dimension_numbers = #tpu.dot_dimension_numbers<[1], [0], [0], [1], [0, 0, 1, 1], [], []>} : vector<16x32xbf16>, vector<32x64xbf16>, vector<16x64xf32> -> vector<16x64xf32>
    %43 = vector.broadcast %37 : vector<1x64xf32> to vector<16x64xf32>
    %44 = arith.addf %42, %43 : vector<16x64xf32>
    %cst_27 = arith.constant 2.000000e-01 : f32
    %45 = vector.broadcast %cst_27 : f32 to vector<16x64xf32>
    %46 = arith.mulf %45, %44 : vector<16x64xf32>
    %47 = arith.maximumf %44, %46 : vector<16x64xf32>
    %48 = arith.mulf %47, %47 : vector<16x64xf32>
    %49 = tpu.concatenate %47, %48 in 1 : vector<16x64xf32>, vector<16x64xf32> -> vector<16x128xf32>
    %cst_28 = arith.constant dense<0.000000e+00> : vector<16x4xf32>
    %50 = tpu.matmul %49, %39, %cst_28 {dimension_numbers = #tpu.dot_dimension_numbers<[1], [0], [0], [1], [0, 0, 1, 1], [], []>} : vector<16x128xf32>, vector<128x4xf32>, vector<16x4xf32> -> vector<16x4xf32>
    %51 = vector.extract_strided_slice %50 {offsets = [0, 0], sizes = [16, 2], strides = [1, 1]} : vector<16x4xf32> to vector<16x2xf32>
    %cst_29 = arith.constant 3.125000e-02 : f32
    %52 = vector.broadcast %cst_29 : f32 to vector<16x2xf32>
    %53 = arith.mulf %51, %52 : vector<16x2xf32>
    %54 = vector.extract_strided_slice %50 {offsets = [0, 2], sizes = [16, 2], strides = [1, 1]} : vector<16x4xf32> to vector<16x2xf32>
    %cst_30 = arith.constant 3.125000e-02 : f32
    %55 = vector.broadcast %cst_30 : f32 to vector<16x2xf32>
    %56 = arith.mulf %54, %55 : vector<16x2xf32>
    %57 = arith.mulf %53, %53 : vector<16x2xf32>
    %58 = arith.subf %56, %57 : vector<16x2xf32>
    %cst_31 = arith.constant 0.000000e+00 : f32
    %59 = vector.broadcast %cst_31 : f32 to vector<16x2xf32>
    %60 = arith.maximumf %58, %59 : vector<16x2xf32>
    %cst_32 = arith.constant 9.99999974E-6 : f32
    %61 = vector.broadcast %cst_32 : f32 to vector<16x2xf32>
    %62 = arith.addf %60, %61 : vector<16x2xf32>
    %63 = math.rsqrt %62 : vector<16x2xf32>
    %64 = tpu.concatenate %63, %53 in 1 : vector<16x2xf32>, vector<16x2xf32> -> vector<16x4xf32>
    %cst_33 = arith.constant dense<0.000000e+00> : vector<16x128xf32>
    %65 = tpu.matmul %64, %40, %cst_33 {dimension_numbers = #tpu.dot_dimension_numbers<[1], [0], [0], [1], [0, 0, 1, 1], [], []>} : vector<16x4xf32>, vector<4x128xf32>, vector<16x128xf32> -> vector<16x128xf32>
    %66 = vector.extract_strided_slice %65 {offsets = [0, 0], sizes = [16, 64], strides = [1, 1]} : vector<16x128xf32> to vector<16x64xf32>
    %67 = vector.extract_strided_slice %65 {offsets = [0, 64], sizes = [16, 64], strides = [1, 1]} : vector<16x128xf32> to vector<16x64xf32>
    %68 = arith.subf %47, %67 : vector<16x64xf32>
    %69 = arith.mulf %68, %66 : vector<16x64xf32>
    %70 = vector.broadcast %38 : vector<1x64xf32> to vector<16x64xf32>
    %71 = arith.addf %69, %70 : vector<16x64xf32>
    %c0_34 = arith.constant 0 : index
    %c0_35 = arith.constant 0 : index
    %72 = vector.load %arg9[%c0_34, %c0_35] : memref<64x128xbf16, #tpu.memory_space<vmem>>, vector<64x128xbf16>
    %c0_36 = arith.constant 0 : index
    %c0_37 = arith.constant 0 : index
    %73 = vector.load %arg10[%c0_36, %c0_37] : memref<1x128xf32, #tpu.memory_space<vmem>>, vector<1x128xf32>
    %c0_38 = arith.constant 0 : index
    %c0_39 = arith.constant 0 : index
    %74 = vector.load %arg11[%c0_38, %c0_39] : memref<1x128xf32, #tpu.memory_space<vmem>>, vector<1x128xf32>
    %c0_40 = arith.constant 0 : index
    %c0_41 = arith.constant 0 : index
    %75 = vector.load %arg17[%c0_40, %c0_41] : memref<256x8xf32, #tpu.memory_space<vmem>>, vector<256x8xf32>
    %c0_42 = arith.constant 0 : index
    %c0_43 = arith.constant 0 : index
    %76 = vector.load %arg18[%c0_42, %c0_43] : memref<8x256xf32, #tpu.memory_space<vmem>>, vector<8x256xf32>
    %77 = arith.truncf %71 : vector<16x64xf32> to vector<16x64xbf16>
    %cst_44 = arith.constant dense<0.000000e+00> : vector<16x128xf32>
    %78 = tpu.matmul %77, %72, %cst_44 {dimension_numbers = #tpu.dot_dimension_numbers<[1], [0], [0], [1], [0, 0, 1, 1], [], []>} : vector<16x64xbf16>, vector<64x128xbf16>, vector<16x128xf32> -> vector<16x128xf32>
    %79 = vector.broadcast %73 : vector<1x128xf32> to vector<16x128xf32>
    %80 = arith.addf %78, %79 : vector<16x128xf32>
    %cst_45 = arith.constant 2.000000e-01 : f32
    %81 = vector.broadcast %cst_45 : f32 to vector<16x128xf32>
    %82 = arith.mulf %81, %80 : vector<16x128xf32>
    %83 = arith.maximumf %80, %82 : vector<16x128xf32>
    %84 = arith.mulf %83, %83 : vector<16x128xf32>
    %85 = tpu.concatenate %83, %84 in 1 : vector<16x128xf32>, vector<16x128xf32> -> vector<16x256xf32>
    %cst_46 = arith.constant dense<0.000000e+00> : vector<16x8xf32>
    %86 = tpu.matmul %85, %75, %cst_46 {dimension_numbers = #tpu.dot_dimension_numbers<[1], [0], [0], [1], [0, 0, 1, 1], [], []>} : vector<16x256xf32>, vector<256x8xf32>, vector<16x8xf32> -> vector<16x8xf32>
    %87 = vector.extract_strided_slice %86 {offsets = [0, 0], sizes = [16, 4], strides = [1, 1]} : vector<16x8xf32> to vector<16x4xf32>
    %cst_47 = arith.constant 3.125000e-02 : f32
    %88 = vector.broadcast %cst_47 : f32 to vector<16x4xf32>
    %89 = arith.mulf %87, %88 : vector<16x4xf32>
    %90 = vector.extract_strided_slice %86 {offsets = [0, 4], sizes = [16, 4], strides = [1, 1]} : vector<16x8xf32> to vector<16x4xf32>
    %cst_48 = arith.constant 3.125000e-02 : f32
    %91 = vector.broadcast %cst_48 : f32 to vector<16x4xf32>
    %92 = arith.mulf %90, %91 : vector<16x4xf32>
    %93 = arith.mulf %89, %89 : vector<16x4xf32>
    %94 = arith.subf %92, %93 : vector<16x4xf32>
    %cst_49 = arith.constant 0.000000e+00 : f32
    %95 = vector.broadcast %cst_49 : f32 to vector<16x4xf32>
    %96 = arith.maximumf %94, %95 : vector<16x4xf32>
    %cst_50 = arith.constant 9.99999974E-6 : f32
    %97 = vector.broadcast %cst_50 : f32 to vector<16x4xf32>
    %98 = arith.addf %96, %97 : vector<16x4xf32>
    %99 = math.rsqrt %98 : vector<16x4xf32>
    %100 = tpu.concatenate %99, %89 in 1 : vector<16x4xf32>, vector<16x4xf32> -> vector<16x8xf32>
    %cst_51 = arith.constant dense<0.000000e+00> : vector<16x256xf32>
    %101 = tpu.matmul %100, %76, %cst_51 {dimension_numbers = #tpu.dot_dimension_numbers<[1], [0], [0], [1], [0, 0, 1, 1], [], []>} : vector<16x8xf32>, vector<8x256xf32>, vector<16x256xf32> -> vector<16x256xf32>
    %102 = vector.extract_strided_slice %101 {offsets = [0, 0], sizes = [16, 128], strides = [1, 1]} : vector<16x256xf32> to vector<16x128xf32>
    %103 = vector.extract_strided_slice %101 {offsets = [0, 128], sizes = [16, 128], strides = [1, 1]} : vector<16x256xf32> to vector<16x128xf32>
    %104 = arith.subf %83, %103 : vector<16x128xf32>
    %105 = arith.mulf %104, %102 : vector<16x128xf32>
    %106 = vector.broadcast %74 : vector<1x128xf32> to vector<16x128xf32>
    %107 = arith.addf %105, %106 : vector<16x128xf32>
    %c0_52 = arith.constant 0 : index
    %c0_53 = arith.constant 0 : index
    %108 = vector.load %arg12[%c0_52, %c0_53] : memref<128x128xbf16, #tpu.memory_space<vmem>>, vector<128x128xbf16>
    %c0_54 = arith.constant 0 : index
    %c0_55 = arith.constant 0 : index
    %109 = vector.load %arg13[%c0_54, %c0_55] : memref<1x128xf32, #tpu.memory_space<vmem>>, vector<1x128xf32>
    %c0_56 = arith.constant 0 : index
    %c0_57 = arith.constant 0 : index
    %110 = vector.load %arg14[%c0_56, %c0_57] : memref<1x128xf32, #tpu.memory_space<vmem>>, vector<1x128xf32>
    %c0_58 = arith.constant 0 : index
    %c0_59 = arith.constant 0 : index
    %111 = vector.load %arg17[%c0_58, %c0_59] : memref<256x8xf32, #tpu.memory_space<vmem>>, vector<256x8xf32>
    %c0_60 = arith.constant 0 : index
    %c0_61 = arith.constant 0 : index
    %112 = vector.load %arg19[%c0_60, %c0_61] : memref<8x256xf32, #tpu.memory_space<vmem>>, vector<8x256xf32>
    %113 = arith.truncf %107 : vector<16x128xf32> to vector<16x128xbf16>
    %cst_62 = arith.constant dense<0.000000e+00> : vector<16x128xf32>
    %114 = tpu.matmul %113, %108, %cst_62 {dimension_numbers = #tpu.dot_dimension_numbers<[1], [0], [0], [1], [0, 0, 1, 1], [], []>} : vector<16x128xbf16>, vector<128x128xbf16>, vector<16x128xf32> -> vector<16x128xf32>
    %115 = vector.broadcast %109 : vector<1x128xf32> to vector<16x128xf32>
    %116 = arith.addf %114, %115 : vector<16x128xf32>
    %cst_63 = arith.constant 2.000000e-01 : f32
    %117 = vector.broadcast %cst_63 : f32 to vector<16x128xf32>
    %118 = arith.mulf %117, %116 : vector<16x128xf32>
    %119 = arith.maximumf %116, %118 : vector<16x128xf32>
    %120 = arith.mulf %119, %119 : vector<16x128xf32>
    %121 = tpu.concatenate %119, %120 in 1 : vector<16x128xf32>, vector<16x128xf32> -> vector<16x256xf32>
    %cst_64 = arith.constant dense<0.000000e+00> : vector<16x8xf32>
    %122 = tpu.matmul %121, %111, %cst_64 {dimension_numbers = #tpu.dot_dimension_numbers<[1], [0], [0], [1], [0, 0, 1, 1], [], []>} : vector<16x256xf32>, vector<256x8xf32>, vector<16x8xf32> -> vector<16x8xf32>
    %123 = vector.extract_strided_slice %122 {offsets = [0, 0], sizes = [16, 4], strides = [1, 1]} : vector<16x8xf32> to vector<16x4xf32>
    %cst_65 = arith.constant 3.125000e-02 : f32
    %124 = vector.broadcast %cst_65 : f32 to vector<16x4xf32>
    %125 = arith.mulf %123, %124 : vector<16x4xf32>
    %126 = vector.extract_strided_slice %122 {offsets = [0, 4], sizes = [16, 4], strides = [1, 1]} : vector<16x8xf32> to vector<16x4xf32>
    %cst_66 = arith.constant 3.125000e-02 : f32
    %127 = vector.broadcast %cst_66 : f32 to vector<16x4xf32>
    %128 = arith.mulf %126, %127 : vector<16x4xf32>
    %129 = arith.mulf %125, %125 : vector<16x4xf32>
    %130 = arith.subf %128, %129 : vector<16x4xf32>
    %cst_67 = arith.constant 0.000000e+00 : f32
    %131 = vector.broadcast %cst_67 : f32 to vector<16x4xf32>
    %132 = arith.maximumf %130, %131 : vector<16x4xf32>
    %cst_68 = arith.constant 9.99999974E-6 : f32
    %133 = vector.broadcast %cst_68 : f32 to vector<16x4xf32>
    %134 = arith.addf %132, %133 : vector<16x4xf32>
    %135 = math.rsqrt %134 : vector<16x4xf32>
    %136 = tpu.concatenate %135, %125 in 1 : vector<16x4xf32>, vector<16x4xf32> -> vector<16x8xf32>
    %cst_69 = arith.constant dense<0.000000e+00> : vector<16x256xf32>
    %137 = tpu.matmul %136, %112, %cst_69 {dimension_numbers = #tpu.dot_dimension_numbers<[1], [0], [0], [1], [0, 0, 1, 1], [], []>} : vector<16x8xf32>, vector<8x256xf32>, vector<16x256xf32> -> vector<16x256xf32>
    %138 = vector.extract_strided_slice %137 {offsets = [0, 0], sizes = [16, 128], strides = [1, 1]} : vector<16x256xf32> to vector<16x128xf32>
    %139 = vector.extract_strided_slice %137 {offsets = [0, 128], sizes = [16, 128], strides = [1, 1]} : vector<16x256xf32> to vector<16x128xf32>
    %140 = arith.subf %119, %139 : vector<16x128xf32>
    %141 = arith.mulf %140, %138 : vector<16x128xf32>
    %142 = vector.broadcast %110 : vector<1x128xf32> to vector<16x128xf32>
    %143 = arith.addf %141, %142 : vector<16x128xf32>
    %144 = arith.truncf %107 : vector<16x128xf32> to vector<16x128xbf16>
    %c0_70 = arith.constant 0 : index
    %c0_71 = arith.constant 0 : index
    %145 = vector.load %arg20[%c0_70, %c0_71] : memref<16x128xbf16, #tpu.memory_space<vmem>>, vector<16x128xbf16>
    tpu.vector_store %arg20[%c0_70, %c0_71], %144 {strides = array<i32>} : memref<16x128xbf16, #tpu.memory_space<vmem>>, vector<16x128xbf16>,
    %c16_i32 = arith.constant 16 : i32
    %146 = arith.muli %arg0, %c16_i32 : i32
    %147 = tpu.iota {dimensions = array<i32: 0>} : vector<16x128xi32>
    %148 = vector.broadcast %146 : i32 to vector<16x128xi32>
    %149 = arith.addi %148, %147 : vector<16x128xi32>
    %c40_i32 = arith.constant 40 : i32
    %150 = vector.broadcast %c40_i32 : i32 to vector<16x128xi32>
    %151 = arith.cmpi slt, %149, %150 : vector<16x128xi32>
    %cst_72 = arith.constant 0xFF800000 : f32
    %152 = vector.broadcast %cst_72 : f32 to vector<16x128xf32>
    %153 = arith.select %151, %143, %152 : vector<16x128xi1>, vector<16x128xf32>
    %cst_73 = arith.constant dense<0xFF800000> : vector<128xf32>
    %154 = vector.multi_reduction <maximumf>, %153, %cst_73 [0] : vector<16x128xf32> to vector<128xf32>
    %155 = vector.shape_cast %154 : vector<128xf32> to vector<1x128xf32>
    %156 = vector.shape_cast %155 : vector<1x128xf32> to vector<1x128xf32>
    %157 = vector.broadcast %156 : vector<1x128xf32> to vector<8x128xf32>
    %c0_74 = arith.constant 0 : index
    %c0_75 = arith.constant 0 : index
    %158 = vector.load %arg21[%c0_74, %c0_75] : memref<8x128xf32, #tpu.memory_space<vmem>>, vector<8x128xf32>
    tpu.vector_store %arg21[%c0_74, %c0_75], %157 {strides = array<i32>} : memref<8x128xf32, #tpu.memory_space<vmem>>, vector<8x128xf32>,
    return
  }
  func.func @transform_0(%arg0: i32) -> (i32, i32) {
    %c0_i32 = arith.constant 0 : i32
    %c0_i32_0 = arith.constant 0 : i32
    return %arg0, %c0_i32 : i32, i32
  }
  func.func @transform_1(%arg0: i32) -> (i32, i32) {
    %c0_i32 = arith.constant 0 : i32
    %c0_i32_0 = arith.constant 0 : i32
    %c0_i32_1 = arith.constant 0 : i32
    return %c0_i32, %c0_i32_0 : i32, i32
  }
  func.func @transform_2(%arg0: i32) -> (i32, i32) {
    %c0_i32 = arith.constant 0 : i32
    %c0_i32_0 = arith.constant 0 : i32
    %c0_i32_1 = arith.constant 0 : i32
    return %c0_i32, %c0_i32_0 : i32, i32
  }
  func.func @transform_3(%arg0: i32) -> (i32, i32) {
    %c0_i32 = arith.constant 0 : i32
    %c0_i32_0 = arith.constant 0 : i32
    %c0_i32_1 = arith.constant 0 : i32
    return %c0_i32, %c0_i32_0 : i32, i32
  }
  func.func @transform_4(%arg0: i32) -> (i32, i32) {
    %c0_i32 = arith.constant 0 : i32
    %c0_i32_0 = arith.constant 0 : i32
    %c0_i32_1 = arith.constant 0 : i32
    return %c0_i32, %c0_i32_0 : i32, i32
  }
  func.func @transform_5(%arg0: i32) -> (i32, i32) {
    %c0_i32 = arith.constant 0 : i32
    %c0_i32_0 = arith.constant 0 : i32
    %c0_i32_1 = arith.constant 0 : i32
    return %c0_i32, %c0_i32_0 : i32, i32
  }
  func.func @transform_6(%arg0: i32) -> (i32, i32) {
    %c0_i32 = arith.constant 0 : i32
    %c0_i32_0 = arith.constant 0 : i32
    %c0_i32_1 = arith.constant 0 : i32
    return %c0_i32, %c0_i32_0 : i32, i32
  }
  func.func @transform_7(%arg0: i32) -> (i32, i32) {
    %c0_i32 = arith.constant 0 : i32
    %c0_i32_0 = arith.constant 0 : i32
    %c0_i32_1 = arith.constant 0 : i32
    return %c0_i32, %c0_i32_0 : i32, i32
  }
  func.func @transform_8(%arg0: i32) -> (i32, i32) {
    %c0_i32 = arith.constant 0 : i32
    %c0_i32_0 = arith.constant 0 : i32
    %c0_i32_1 = arith.constant 0 : i32
    return %c0_i32, %c0_i32_0 : i32, i32
  }
  func.func @transform_9(%arg0: i32) -> (i32, i32) {
    %c0_i32 = arith.constant 0 : i32
    %c0_i32_0 = arith.constant 0 : i32
    %c0_i32_1 = arith.constant 0 : i32
    return %c0_i32, %c0_i32_0 : i32, i32
  }
  func.func @transform_10(%arg0: i32) -> (i32, i32) {
    %c0_i32 = arith.constant 0 : i32
    %c0_i32_0 = arith.constant 0 : i32
    %c0_i32_1 = arith.constant 0 : i32
    return %c0_i32, %c0_i32_0 : i32, i32
  }
  func.func @transform_11(%arg0: i32) -> (i32, i32) {
    %c0_i32 = arith.constant 0 : i32
    %c0_i32_0 = arith.constant 0 : i32
    %c0_i32_1 = arith.constant 0 : i32
    return %c0_i32, %c0_i32_0 : i32, i32
  }
  func.func @transform_12(%arg0: i32) -> (i32, i32) {
    %c0_i32 = arith.constant 0 : i32
    %c0_i32_0 = arith.constant 0 : i32
    %c0_i32_1 = arith.constant 0 : i32
    return %c0_i32, %c0_i32_0 : i32, i32
  }
  func.func @transform_13(%arg0: i32) -> (i32, i32) {
    %c0_i32 = arith.constant 0 : i32
    %c0_i32_0 = arith.constant 0 : i32
    %c0_i32_1 = arith.constant 0 : i32
    return %c0_i32, %c0_i32_0 : i32, i32
  }
  func.func @transform_14(%arg0: i32) -> (i32, i32) {
    %c0_i32 = arith.constant 0 : i32
    %c0_i32_0 = arith.constant 0 : i32
    %c0_i32_1 = arith.constant 0 : i32
    return %c0_i32, %c0_i32_0 : i32, i32
  }
  func.func @transform_15(%arg0: i32) -> (i32, i32) {
    %c0_i32 = arith.constant 0 : i32
    %c0_i32_0 = arith.constant 0 : i32
    %c0_i32_1 = arith.constant 0 : i32
    return %c0_i32, %c0_i32_0 : i32, i32
  }
  func.func @transform_16(%arg0: i32) -> (i32, i32) {
    %c0_i32 = arith.constant 0 : i32
    %c0_i32_0 = arith.constant 0 : i32
    %c0_i32_1 = arith.constant 0 : i32
    return %c0_i32, %c0_i32_0 : i32, i32
  }
  func.func @transform_17(%arg0: i32) -> (i32, i32) {
    %c0_i32 = arith.constant 0 : i32
    %c0_i32_0 = arith.constant 0 : i32
    %c0_i32_1 = arith.constant 0 : i32
    return %c0_i32, %c0_i32_0 : i32, i32
  }
  func.func @transform_18(%arg0: i32) -> (i32, i32) {
    %c0_i32 = arith.constant 0 : i32
    %c0_i32_0 = arith.constant 0 : i32
    %c0_i32_1 = arith.constant 0 : i32
    return %c0_i32, %c0_i32_0 : i32, i32
  }
  func.func @transform_19(%arg0: i32) -> (i32, i32) {
    %c0_i32 = arith.constant 0 : i32
    %c0_i32_0 = arith.constant 0 : i32
    return %arg0, %c0_i32 : i32, i32
  }
  func.func @transform_20(%arg0: i32) -> (i32, i32) {
    %c0_i32 = arith.constant 0 : i32
    %c0_i32_0 = arith.constant 0 : i32
    return %arg0, %c0_i32 : i32, i32
  }
}

module attributes {stable_mosaic.version = 11 : i64} {
  func.func @_head_kernel(%arg0: i32, %arg1: memref<16x128xbf16, #tpu.memory_space<vmem>>, %arg2: memref<1x128xf32, #tpu.memory_space<vmem>>, %arg3: memref<128x128xbf16, #tpu.memory_space<vmem>>, %arg4: memref<1x128xf32, #tpu.memory_space<vmem>>, %arg5: memref<128x64xbf16, #tpu.memory_space<vmem>>, %arg6: memref<1x64xf32, #tpu.memory_space<vmem>>, %arg7: memref<1x64xf32, #tpu.memory_space<vmem>>, %arg8: memref<64x8xbf16, #tpu.memory_space<vmem>>, %arg9: memref<1x8xf32, #tpu.memory_space<vmem>>, %arg10: memref<128x4xf32, #tpu.memory_space<vmem>>, %arg11: memref<4x128xf32, #tpu.memory_space<vmem>>, %arg12: memref<256x8xf32, #tpu.memory_space<vmem>>, %arg13: memref<8x256xf32, #tpu.memory_space<vmem>>, %arg14: memref<16x8xf32, #tpu.memory_space<vmem>>) attributes {dimension_semantics = [#tpu.dimension_semantics<parallel>], iteration_bounds = array<i64: 3>, scalar_prefetch = 0 : i64, scratch_operands = 0 : i64, tpu.core_type = #tpu.core_type<tc>, window_params = [{transform_indices = @transform_0, window_bounds = array<i64: 16, 128>}, {pipeline_mode = #tpu.pipeline_mode<synchronous>, transform_indices = @transform_1, window_bounds = array<i64: 1, 128>}, {pipeline_mode = #tpu.pipeline_mode<synchronous>, transform_indices = @transform_2, window_bounds = array<i64: 128, 128>}, {pipeline_mode = #tpu.pipeline_mode<synchronous>, transform_indices = @transform_3, window_bounds = array<i64: 1, 128>}, {pipeline_mode = #tpu.pipeline_mode<synchronous>, transform_indices = @transform_4, window_bounds = array<i64: 128, 64>}, {pipeline_mode = #tpu.pipeline_mode<synchronous>, transform_indices = @transform_5, window_bounds = array<i64: 1, 64>}, {pipeline_mode = #tpu.pipeline_mode<synchronous>, transform_indices = @transform_6, window_bounds = array<i64: 1, 64>}, {pipeline_mode = #tpu.pipeline_mode<synchronous>, transform_indices = @transform_7, window_bounds = array<i64: 64, 8>}, {pipeline_mode = #tpu.pipeline_mode<synchronous>, transform_indices = @transform_8, window_bounds = array<i64: 1, 8>}, {pipeline_mode = #tpu.pipeline_mode<synchronous>, transform_indices = @transform_9, window_bounds = array<i64: 128, 4>}, {pipeline_mode = #tpu.pipeline_mode<synchronous>, transform_indices = @transform_10, window_bounds = array<i64: 4, 128>}, {pipeline_mode = #tpu.pipeline_mode<synchronous>, transform_indices = @transform_11, window_bounds = array<i64: 256, 8>}, {pipeline_mode = #tpu.pipeline_mode<synchronous>, transform_indices = @transform_12, window_bounds = array<i64: 8, 256>}, {transform_indices = @transform_13, window_bounds = array<i64: 16, 8>}]} {
    %c0 = arith.constant 0 : index
    %c0_0 = arith.constant 0 : index
    %0 = vector.load %arg1[%c0, %c0_0] : memref<16x128xbf16, #tpu.memory_space<vmem>>, vector<16x128xbf16>
    %c0_1 = arith.constant 0 : index
    %c0_2 = arith.constant 0 : index
    %1 = vector.load %arg3[%c0_1, %c0_2] : memref<128x128xbf16, #tpu.memory_space<vmem>>, vector<128x128xbf16>
    %cst = arith.constant dense<0.000000e+00> : vector<16x128xf32>
    %2 = tpu.matmul %0, %1, %cst {dimension_numbers = #tpu.dot_dimension_numbers<[1], [0], [0], [1], [0, 0, 1, 1], [], []>} : vector<16x128xbf16>, vector<128x128xbf16>, vector<16x128xf32> -> vector<16x128xf32>
    %c0_3 = arith.constant 0 : index
    %c0_4 = arith.constant 0 : index
    %3 = vector.load %arg2[%c0_3, %c0_4] : memref<1x128xf32, #tpu.memory_space<vmem>>, vector<1x128xf32>
    %4 = vector.broadcast %3 : vector<1x128xf32> to vector<16x128xf32>
    %5 = arith.addf %2, %4 : vector<16x128xf32>
    %cst_5 = arith.constant 2.000000e-01 : f32
    %6 = vector.broadcast %cst_5 : f32 to vector<16x128xf32>
    %7 = arith.mulf %6, %5 : vector<16x128xf32>
    %8 = arith.maximumf %5, %7 : vector<16x128xf32>
    %c0_6 = arith.constant 0 : index
    %c0_7 = arith.constant 0 : index
    %9 = vector.load %arg4[%c0_6, %c0_7] : memref<1x128xf32, #tpu.memory_space<vmem>>, vector<1x128xf32>
    %c0_8 = arith.constant 0 : index
    %c0_9 = arith.constant 0 : index
    %10 = vector.load %arg12[%c0_8, %c0_9] : memref<256x8xf32, #tpu.memory_space<vmem>>, vector<256x8xf32>
    %c0_10 = arith.constant 0 : index
    %c0_11 = arith.constant 0 : index
    %11 = vector.load %arg13[%c0_10, %c0_11] : memref<8x256xf32, #tpu.memory_space<vmem>>, vector<8x256xf32>
    %12 = arith.mulf %8, %8 : vector<16x128xf32>
    %13 = tpu.concatenate %8, %12 in 1 : vector<16x128xf32>, vector<16x128xf32> -> vector<16x256xf32>
    %cst_12 = arith.constant dense<0.000000e+00> : vector<16x8xf32>
    %14 = tpu.matmul %13, %10, %cst_12 {dimension_numbers = #tpu.dot_dimension_numbers<[1], [0], [0], [1], [0, 0, 1, 1], [], []>} : vector<16x256xf32>, vector<256x8xf32>, vector<16x8xf32> -> vector<16x8xf32>
    %15 = vector.extract_strided_slice %14 {offsets = [0, 0], sizes = [16, 4], strides = [1, 1]} : vector<16x8xf32> to vector<16x4xf32>
    %cst_13 = arith.constant 3.125000e-02 : f32
    %16 = vector.broadcast %cst_13 : f32 to vector<16x4xf32>
    %17 = arith.mulf %15, %16 : vector<16x4xf32>
    %18 = vector.extract_strided_slice %14 {offsets = [0, 4], sizes = [16, 4], strides = [1, 1]} : vector<16x8xf32> to vector<16x4xf32>
    %cst_14 = arith.constant 3.125000e-02 : f32
    %19 = vector.broadcast %cst_14 : f32 to vector<16x4xf32>
    %20 = arith.mulf %18, %19 : vector<16x4xf32>
    %21 = arith.mulf %17, %17 : vector<16x4xf32>
    %22 = arith.subf %20, %21 : vector<16x4xf32>
    %cst_15 = arith.constant 0.000000e+00 : f32
    %23 = vector.broadcast %cst_15 : f32 to vector<16x4xf32>
    %24 = arith.maximumf %22, %23 : vector<16x4xf32>
    %cst_16 = arith.constant 9.99999974E-6 : f32
    %25 = vector.broadcast %cst_16 : f32 to vector<16x4xf32>
    %26 = arith.addf %24, %25 : vector<16x4xf32>
    %27 = math.rsqrt %26 : vector<16x4xf32>
    %28 = tpu.concatenate %27, %17 in 1 : vector<16x4xf32>, vector<16x4xf32> -> vector<16x8xf32>
    %cst_17 = arith.constant dense<0.000000e+00> : vector<16x256xf32>
    %29 = tpu.matmul %28, %11, %cst_17 {dimension_numbers = #tpu.dot_dimension_numbers<[1], [0], [0], [1], [0, 0, 1, 1], [], []>} : vector<16x8xf32>, vector<8x256xf32>, vector<16x256xf32> -> vector<16x256xf32>
    %30 = vector.extract_strided_slice %29 {offsets = [0, 0], sizes = [16, 128], strides = [1, 1]} : vector<16x256xf32> to vector<16x128xf32>
    %31 = vector.extract_strided_slice %29 {offsets = [0, 128], sizes = [16, 128], strides = [1, 1]} : vector<16x256xf32> to vector<16x128xf32>
    %32 = arith.subf %8, %31 : vector<16x128xf32>
    %33 = arith.mulf %32, %30 : vector<16x128xf32>
    %34 = vector.broadcast %9 : vector<1x128xf32> to vector<16x128xf32>
    %35 = arith.addf %33, %34 : vector<16x128xf32>
    %c0_18 = arith.constant 0 : index
    %c0_19 = arith.constant 0 : index
    %36 = vector.load %arg5[%c0_18, %c0_19] : memref<128x64xbf16, #tpu.memory_space<vmem>>, vector<128x64xbf16>
    %c0_20 = arith.constant 0 : index
    %c0_21 = arith.constant 0 : index
    %37 = vector.load %arg6[%c0_20, %c0_21] : memref<1x64xf32, #tpu.memory_space<vmem>>, vector<1x64xf32>
    %c0_22 = arith.constant 0 : index
    %c0_23 = arith.constant 0 : index
    %38 = vector.load %arg7[%c0_22, %c0_23] : memref<1x64xf32, #tpu.memory_space<vmem>>, vector<1x64xf32>
    %c0_24 = arith.constant 0 : index
    %c0_25 = arith.constant 0 : index
    %39 = vector.load %arg10[%c0_24, %c0_25] : memref<128x4xf32, #tpu.memory_space<vmem>>, vector<128x4xf32>
    %c0_26 = arith.constant 0 : index
    %c0_27 = arith.constant 0 : index
    %40 = vector.load %arg11[%c0_26, %c0_27] : memref<4x128xf32, #tpu.memory_space<vmem>>, vector<4x128xf32>
    %41 = arith.truncf %35 : vector<16x128xf32> to vector<16x128xbf16>
    %cst_28 = arith.constant dense<0.000000e+00> : vector<16x64xf32>
    %42 = tpu.matmul %41, %36, %cst_28 {dimension_numbers = #tpu.dot_dimension_numbers<[1], [0], [0], [1], [0, 0, 1, 1], [], []>} : vector<16x128xbf16>, vector<128x64xbf16>, vector<16x64xf32> -> vector<16x64xf32>
    %43 = vector.broadcast %37 : vector<1x64xf32> to vector<16x64xf32>
    %44 = arith.addf %42, %43 : vector<16x64xf32>
    %cst_29 = arith.constant 2.000000e-01 : f32
    %45 = vector.broadcast %cst_29 : f32 to vector<16x64xf32>
    %46 = arith.mulf %45, %44 : vector<16x64xf32>
    %47 = arith.maximumf %44, %46 : vector<16x64xf32>
    %48 = arith.mulf %47, %47 : vector<16x64xf32>
    %49 = tpu.concatenate %47, %48 in 1 : vector<16x64xf32>, vector<16x64xf32> -> vector<16x128xf32>
    %cst_30 = arith.constant dense<0.000000e+00> : vector<16x4xf32>
    %50 = tpu.matmul %49, %39, %cst_30 {dimension_numbers = #tpu.dot_dimension_numbers<[1], [0], [0], [1], [0, 0, 1, 1], [], []>} : vector<16x128xf32>, vector<128x4xf32>, vector<16x4xf32> -> vector<16x4xf32>
    %51 = vector.extract_strided_slice %50 {offsets = [0, 0], sizes = [16, 2], strides = [1, 1]} : vector<16x4xf32> to vector<16x2xf32>
    %cst_31 = arith.constant 3.125000e-02 : f32
    %52 = vector.broadcast %cst_31 : f32 to vector<16x2xf32>
    %53 = arith.mulf %51, %52 : vector<16x2xf32>
    %54 = vector.extract_strided_slice %50 {offsets = [0, 2], sizes = [16, 2], strides = [1, 1]} : vector<16x4xf32> to vector<16x2xf32>
    %cst_32 = arith.constant 3.125000e-02 : f32
    %55 = vector.broadcast %cst_32 : f32 to vector<16x2xf32>
    %56 = arith.mulf %54, %55 : vector<16x2xf32>
    %57 = arith.mulf %53, %53 : vector<16x2xf32>
    %58 = arith.subf %56, %57 : vector<16x2xf32>
    %cst_33 = arith.constant 0.000000e+00 : f32
    %59 = vector.broadcast %cst_33 : f32 to vector<16x2xf32>
    %60 = arith.maximumf %58, %59 : vector<16x2xf32>
    %cst_34 = arith.constant 9.99999974E-6 : f32
    %61 = vector.broadcast %cst_34 : f32 to vector<16x2xf32>
    %62 = arith.addf %60, %61 : vector<16x2xf32>
    %63 = math.rsqrt %62 : vector<16x2xf32>
    %64 = tpu.concatenate %63, %53 in 1 : vector<16x2xf32>, vector<16x2xf32> -> vector<16x4xf32>
    %cst_35 = arith.constant dense<0.000000e+00> : vector<16x128xf32>
    %65 = tpu.matmul %64, %40, %cst_35 {dimension_numbers = #tpu.dot_dimension_numbers<[1], [0], [0], [1], [0, 0, 1, 1], [], []>} : vector<16x4xf32>, vector<4x128xf32>, vector<16x128xf32> -> vector<16x128xf32>
    %66 = vector.extract_strided_slice %65 {offsets = [0, 0], sizes = [16, 64], strides = [1, 1]} : vector<16x128xf32> to vector<16x64xf32>
    %67 = vector.extract_strided_slice %65 {offsets = [0, 64], sizes = [16, 64], strides = [1, 1]} : vector<16x128xf32> to vector<16x64xf32>
    %68 = arith.subf %47, %67 : vector<16x64xf32>
    %69 = arith.mulf %68, %66 : vector<16x64xf32>
    %70 = vector.broadcast %38 : vector<1x64xf32> to vector<16x64xf32>
    %71 = arith.addf %69, %70 : vector<16x64xf32>
    %72 = arith.truncf %71 : vector<16x64xf32> to vector<16x64xbf16>
    %c0_36 = arith.constant 0 : index
    %c0_37 = arith.constant 0 : index
    %73 = vector.load %arg8[%c0_36, %c0_37] : memref<64x8xbf16, #tpu.memory_space<vmem>>, vector<64x8xbf16>
    %cst_38 = arith.constant dense<0.000000e+00> : vector<16x8xf32>
    %74 = tpu.matmul %72, %73, %cst_38 {dimension_numbers = #tpu.dot_dimension_numbers<[1], [0], [0], [1], [0, 0, 1, 1], [], []>} : vector<16x64xbf16>, vector<64x8xbf16>, vector<16x8xf32> -> vector<16x8xf32>
    %c0_39 = arith.constant 0 : index
    %c0_40 = arith.constant 0 : index
    %75 = vector.load %arg9[%c0_39, %c0_40] : memref<1x8xf32, #tpu.memory_space<vmem>>, vector<1x8xf32>
    %76 = vector.broadcast %75 : vector<1x8xf32> to vector<16x8xf32>
    %77 = arith.addf %74, %76 : vector<16x8xf32>
    %c0_41 = arith.constant 0 : index
    %c0_42 = arith.constant 0 : index
    %78 = vector.load %arg14[%c0_41, %c0_42] : memref<16x8xf32, #tpu.memory_space<vmem>>, vector<16x8xf32>
    tpu.vector_store %arg14[%c0_41, %c0_42], %77 {strides = array<i32>} : memref<16x8xf32, #tpu.memory_space<vmem>>, vector<16x8xf32>,
    return
  }
  func.func @transform_0(%arg0: i32) -> (i32, i32) {
    %c0_i32 = arith.constant 0 : i32
    %c0_i32_0 = arith.constant 0 : i32
    return %arg0, %c0_i32 : i32, i32
  }
  func.func @transform_1(%arg0: i32) -> (i32, i32) {
    %c0_i32 = arith.constant 0 : i32
    %c0_i32_0 = arith.constant 0 : i32
    %c0_i32_1 = arith.constant 0 : i32
    return %c0_i32, %c0_i32_0 : i32, i32
  }
  func.func @transform_2(%arg0: i32) -> (i32, i32) {
    %c0_i32 = arith.constant 0 : i32
    %c0_i32_0 = arith.constant 0 : i32
    %c0_i32_1 = arith.constant 0 : i32
    return %c0_i32, %c0_i32_0 : i32, i32
  }
  func.func @transform_3(%arg0: i32) -> (i32, i32) {
    %c0_i32 = arith.constant 0 : i32
    %c0_i32_0 = arith.constant 0 : i32
    %c0_i32_1 = arith.constant 0 : i32
    return %c0_i32, %c0_i32_0 : i32, i32
  }
  func.func @transform_4(%arg0: i32) -> (i32, i32) {
    %c0_i32 = arith.constant 0 : i32
    %c0_i32_0 = arith.constant 0 : i32
    %c0_i32_1 = arith.constant 0 : i32
    return %c0_i32, %c0_i32_0 : i32, i32
  }
  func.func @transform_5(%arg0: i32) -> (i32, i32) {
    %c0_i32 = arith.constant 0 : i32
    %c0_i32_0 = arith.constant 0 : i32
    %c0_i32_1 = arith.constant 0 : i32
    return %c0_i32, %c0_i32_0 : i32, i32
  }
  func.func @transform_6(%arg0: i32) -> (i32, i32) {
    %c0_i32 = arith.constant 0 : i32
    %c0_i32_0 = arith.constant 0 : i32
    %c0_i32_1 = arith.constant 0 : i32
    return %c0_i32, %c0_i32_0 : i32, i32
  }
  func.func @transform_7(%arg0: i32) -> (i32, i32) {
    %c0_i32 = arith.constant 0 : i32
    %c0_i32_0 = arith.constant 0 : i32
    %c0_i32_1 = arith.constant 0 : i32
    return %c0_i32, %c0_i32_0 : i32, i32
  }
  func.func @transform_8(%arg0: i32) -> (i32, i32) {
    %c0_i32 = arith.constant 0 : i32
    %c0_i32_0 = arith.constant 0 : i32
    %c0_i32_1 = arith.constant 0 : i32
    return %c0_i32, %c0_i32_0 : i32, i32
  }
  func.func @transform_9(%arg0: i32) -> (i32, i32) {
    %c0_i32 = arith.constant 0 : i32
    %c0_i32_0 = arith.constant 0 : i32
    %c0_i32_1 = arith.constant 0 : i32
    return %c0_i32, %c0_i32_0 : i32, i32
  }
  func.func @transform_10(%arg0: i32) -> (i32, i32) {
    %c0_i32 = arith.constant 0 : i32
    %c0_i32_0 = arith.constant 0 : i32
    %c0_i32_1 = arith.constant 0 : i32
    return %c0_i32, %c0_i32_0 : i32, i32
  }
  func.func @transform_11(%arg0: i32) -> (i32, i32) {
    %c0_i32 = arith.constant 0 : i32
    %c0_i32_0 = arith.constant 0 : i32
    %c0_i32_1 = arith.constant 0 : i32
    return %c0_i32, %c0_i32_0 : i32, i32
  }
  func.func @transform_12(%arg0: i32) -> (i32, i32) {
    %c0_i32 = arith.constant 0 : i32
    %c0_i32_0 = arith.constant 0 : i32
    %c0_i32_1 = arith.constant 0 : i32
    return %c0_i32, %c0_i32_0 : i32, i32
  }
  func.func @transform_13(%arg0: i32) -> (i32, i32) {
    %c0_i32 = arith.constant 0 : i32
    %c0_i32_0 = arith.constant 0 : i32
    return %arg0, %c0_i32 : i32, i32
  }
}

</mosaic_0001>

<bundles_post_ra>
// kernel: pointnet_forward.3
= control target key start
LH: loop header
LB: loop body
LE: loop exit
PB: predicated region body
PF: predicated region fallthrough
CT: control target
= control target key end

     0   :  { %s1676_s25 = smov 0   ;;  %s1994_s0 = inlined_call_operand.vmem [shape: bf16[48,128], index: 0, kind: input, shape index: {}]   ;;  %s1995_s1 = inlined_call_operand.vmem [shape: f32[1,128], index: 1, kind: input, shape index: {}]   ;;  %s1996_s2 = inlined_call_operand.vmem [shape: bf16[128,128], index: 2, kind: input, shape index: {}]   ;;  %s1997_s3 = inlined_call_operand.vmem [shape: f32[1,128], index: 3, kind: input, shape index: {}]   ;;  %s1998_s4 = inlined_call_operand.vmem [shape: bf16[128,64], index: 4, kind: input, shape index: {}]   ;;  %s1999_s5 = inlined_call_operand.vmem [shape: f32[1,64], index: 5, kind: input, shape index: {}]   ;;  %s2000_s6 = inlined_call_operand.vmem [shape: f32[1,64], index: 6, kind: input, shape index: {}]   ;;  %s2001_s7 = inlined_call_operand.vmem [shape: bf16[64,8], index: 7, kind: input, shape index: {}]   ;;  %s2002_s8 = inlined_call_operand.vmem [shape: f32[1,8], index: 8, kind: input, shape index: {}]   ;;  %s2003_s9 = inlined_call_operand.vmem [shape: f32[128,4], index: 9, kind: input, shape index: {}]   ;;  %s2004_s10 = inlined_call_operand.vmem [shape: f32[4,128], index: 10, kind: input, shape index: {}]   ;;  %s2005_s11 = inlined_call_operand.vmem [shape: f32[256,8], index: 11, kind: input, shape index: {}]   ;;  %s2006_s12 = inlined_call_operand.vmem [shape: f32[8,256], index: 12, kind: input, shape index: {}]   ;;  %s2007_s13 = inlined_call_operand.vmem [shape: f32[48,8], index: 13, kind: output, shape index: {}]  }
   0x1 LB: > { %s1325_s26 = sadd.s32 4294967295, %s1597_s25   ;;  %p1329_p0 = scmp.ge.s32.totalorder %s1597_s25, 1  ;;  %s1597_s25 = sphi %s1676_s25, %s23_s25  }
   0x2   : > { %p388_p1 = scmp.lt.s32.totalorder %s1597_s25, 4 }
   0x4   : > { %p389_p2 = pnand %p1329_p0, %p388_p1 }
   0x5   : > { %s1330_s14 = sshll.u32 (!%p389_p2), %s1325_s26, 1  ;;  %s1601_s26 = smov (!%p389_p2), 4  }
   0x6   : > { %392 = sbr.rel (%p389_p2) target bundleno = 2203 (0x89b), region = 72  ;;  %p433_p3 = scmp.lt.s32.totalorder (!%p389_p2), %s1330_s14, 5 }
   0x7   : > { %s1602_s15 = smov (!%p389_p2), 124   ;;  %s1603_s24 = smov (!%p389_p2), 64  }
   0x8   : > { %s1605_s28 = smov (!%p389_p2), 126  }
   0xb   : > { %v1562_v0 = vld [vmem:[%s1996_s2 + $0x38] sm:$0xff]   ;;  %v1599_v1 = vmov 0.0   ;;  %v1563_v2 = vld [vmem:[%s1996_s2 + $0x30] sm:$0xff]   ;;  %vm1600_vm0 = vmmov 0   ;;  %s2009_s14 = smov (!%p433_p3, %s1330_s14), 5  ;;  %v1564_v3 = vld [vmem:[%s1996_s2 + $0x28] sm:$0xff]  }
   0xc   : > { %1450 = vmatprep.subr.bf16.mxu0 %v1599_v1  ;;  %1466 = vmatprep.mubr.msk.bf16.mxu0 %vm1600_vm0, %v1599_v1  ;;  %s1331_s17 = sshll.u32 %s2009_s14, 2  ;;  %v601_v4 = vld [vmem:[%s2005_s11 + $0xf8] sm:$0xff]  ;;  %v600_v6 = vld [vmem:[%s2005_s11 + $0xf0] sm:$0xff]  ;;  %v1565_v7 = vld [vmem:[%s1996_s2 + $0x20] sm:$0xff]   ;;  %vm717_vm1 = vcmask 31744   ;;  %vm720_vm2 = vcmask 64512  }
   0xd   : > { %1451 = vmatpush3.bf16.msra.mxu0 %v1562_v0  ;;  %s1704_s20 = scalar_lea.vmem %s1994_s0, %s1331_s17  ;;  %v585_v5 = vld [vmem:[%s2005_s11 + $0x78] sm:$0xff]  ;;  %1377 = vmatprep.subr.mxu1 %v601_v4  ;;  %v584_v8 = vld [vmem:[%s2005_s11 + $0x70] sm:$0xff]  ;;  %v599_v9 = vld [vmem:[%s2005_s11 + $0xe8] sm:$0xff]  ;;  %vm961_vm3 = vcmask 523264   ;;  %vm1084_vm4 = vcmask 1043456   ;;  %vm1075_vm5 = vcmask 15360  }
   0xe   : > { %1452 = vmatprep.subr.bf16.mxu0 %v1599_v1  ;;  %1378 = vmatpush3.msra.mxu1 %v585_v5  ;;  %v583_v10 = vld [vmem:[%s2005_s11 + $0x68] sm:$0xff]  ;;  %v598_v11 = vld [vmem:[%s2005_s11 + $0xe0] sm:$0xff]  ;;  %v1566_v13 = vld [vmem:[%s1996_s2 + $0x18] sm:$0xff]  }
   0xf   : > { %1379 = vmatprep.subr.mxu1 %v600_v6  ;;  %v582_v12 = vld [vmem:[%s2005_s11 + $0x60] sm:$0xff]  ;;  %v597_v14 = vld [vmem:[%s2005_s11 + $0xd8] sm:$0xff]  ;;  %v596_v16 = vld [vmem:[%s2005_s11 + $0xd0] sm:$0xff] }
  0x10   : > { %1380 = vmatpush3.msra.mxu1 %v584_v8  ;;  %v581_v15 = vld [vmem:[%s2005_s11 + $0x58] sm:$0xff]  ;;  %v1567_v17 = vld [vmem:[%s1996_s2 + $0x10] sm:$0xff]   ;;  %v595_v19 = vld [vmem:[%s2005_s11 + $0xc8] sm:$0xff] }
  0x11   : > { %1453 = vmatpush3.bf16.msra.mxu0 %v1563_v2  ;;  %1381 = vmatprep.subr.mxu1 %v599_v9  ;;  %v580_v18 = vld [vmem:[%s2005_s11 + $0x50] sm:$0xff]  ;;  %v579_v20 = vld [vmem:[%s2005_s11 + $0x48] sm:$0xff]  ;;  %v594_v21 = vld [vmem:[%s2005_s11 + $0xc0] sm:$0xff] }
  0x12   : > { %1454 = vmatprep.subr.bf16.mxu0 %v1599_v1  ;;  %1382 = vmatpush3.msra.mxu1 %v583_v10  ;;  %v578_v22 = vld [vmem:[%s2005_s11 + $0x40] sm:$0xff]  ;;  %v1568_v23 = vld [vmem:[%s1996_s2 + $0x8] sm:$0xff]   ;;  %v593_v24 = vld [vmem:[%s2005_s11 + $0xb8] sm:$0xff] }
  0x13   : > { %1383 = vmatprep.subr.mxu1 %v598_v11  ;;  %v577_v25 = vld [vmem:[%s2005_s11 + $0x38] sm:$0xff]  ;;  %v592_v26 = vld [vmem:[%s2005_s11 + $0xb0] sm:$0xff]  ;;  %v1569_v28 = vld [vmem:[%s1996_s2] sm:$0xff]  }
  0x14   : > { %1384 = vmatpush3.msra.mxu1 %v582_v12  ;;  %v576_v27 = vld [vmem:[%s2005_s11 + $0x30] sm:$0xff]  ;;  %v591_v29 = vld [vmem:[%s2005_s11 + $0xa8] sm:$0xff]  ;;  %v1570_v31 = vld [vmem:[%s1704_s20] sm:$0xff]   ;;  %s1604_s20 = smov 2  }
  0x15   : > { %1455 = vmatpush3.bf16.msra.mxu0 %v1564_v3  ;;  %1385 = vmatprep.subr.mxu1 %v597_v14  ;;  %v575_v30 = vld [vmem:[%s2005_s11 + $0x28] sm:$0xff]  ;;  %v590_v32 = vld [vmem:[%s2005_s11 + $0xa0] sm:$0xff]  ;;  %v589_v34 = vld [vmem:[%s2005_s11 + $0x98] sm:$0xff] }
  0x16   : > { %1456 = vmatprep.subr.bf16.mxu0 %v1599_v1  ;;  %1386 = vmatpush3.msra.mxu1 %v581_v15  ;;  %v574_v33 = vld [vmem:[%s2005_s11 + $0x20] sm:$0xff]  ;;  %v573_v35 = vld [vmem:[%s2005_s11 + $0x18] sm:$0xff]  ;;  %v588_v36 = vld [vmem:[%s2005_s11 + $0x90] sm:$0xff] }
  0x17   : > { %1387 = vmatprep.subr.mxu1 %v596_v16  ;;  %v572_v37 = vld [vmem:[%s2005_s11 + $0x10] sm:$0xff]  ;;  %v587_v38 = vld [vmem:[%s2005_s11 + $0x88] sm:$0xff]  ;;  %v586_v40 = vld [vmem:[%s2005_s11 + $0x80] sm:$0xff] }
  0x18   : > { %1388 = vmatpush3.msra.mxu1 %v580_v18  ;;  %v571_v39 = vld [vmem:[%s2005_s11 + $0x8] sm:$0xff]  ;;  %v570_v41 = vld [vmem:[%s2005_s11] sm:$0xff]  ;;  %v1571_v15 = vld [vmem:[%s1998_s4 + $0x38] sm:$0xff]  }
  0x19   : > { %1457 = vmatpush3.bf16.msra.mxu0 %v1565_v7  ;;  %1389 = vmatprep.subr.mxu1 %v595_v19  ;;  %v1334_v42 = vld [vmem:[%s1995_s1] ss:$0 sm:$0xff]  ;;  %v603_v2 = vld [vmem:[%s2006_s12 + $0x8] sm:$0xff]  ;;  %v1572_v18 = vld [vmem:[%s1998_s4 + $0x30] sm:$0xff]  }
  0x1a   : > { %1458 = vmatprep.subr.bf16.mxu0 %v1599_v1  ;;  %1390 = vmatpush3.msra.mxu1 %v579_v20  ;;  %v602_v3 = vld [vmem:[%s2006_s12] sm:$0xff] }
  0x1b   : > { %1391 = vmatprep.subr.mxu1 %v594_v21 }
  0x1c   : > { %1392 = vmatpush3.msra.mxu1 %v578_v22  ;;  %v1573_v22 = vld [vmem:[%s1998_s4 + $0x28] sm:$0xff]  }
  0x1d   : > { %1459 = vmatpush3.bf16.msra.mxu0 %v1566_v13  ;;  %1393 = vmatprep.subr.mxu1 %v593_v24  ;;  %v1575_v24 = vld [vmem:[%s1998_s4 + $0x18] sm:$0xff]  }
  0x1e   : > { %1460 = vmatprep.subr.bf16.mxu0 %v1599_v1  ;;  %1394 = vmatpush3.msra.mxu1 %v577_v25  ;;  %v1576_v25 = vld [vmem:[%s1998_s4 + $0x10] sm:$0xff]  }
  0x1f   : > { %1395 = vmatprep.subr.mxu1 %v592_v26  ;;  %v1577_v26 = vld [vmem:[%s1998_s4 + $0x8] sm:$0xff]  }
  0x20   : > { %1396 = vmatpush3.msra.mxu1 %v576_v27  ;;  %v1578_v27 = vld [vmem:[%s1998_s4] sm:$0xff]  }
  0x21   : > { %1461 = vmatpush3.bf16.msra.mxu0 %v1567_v17  ;;  %1397 = vmatprep.subr.mxu1 %v591_v29 }
  0x22   : > { %1462 = vmatprep.subr.bf16.mxu0 %v1599_v1  ;;  %1398 = vmatpush3.msra.mxu1 %v575_v30 }
  0x23   : > { %1399 = vmatprep.subr.mxu1 %v590_v32 }
  0x24   : > { %1400 = vmatpush3.msra.mxu1 %v574_v33 }
  0x25   : > { %1463 = vmatpush3.bf16.msra.mxu0 %v1568_v23  ;;  %1401 = vmatprep.subr.mxu1 %v589_v34  ;;  %v1574_v23 = vld [vmem:[%s1998_s4 + $0x20] sm:$0xff]  }
  0x26   : > { %1464 = vmatprep.subr.bf16.mxu0 %v1599_v1  ;;  %1402 = vmatpush3.msra.mxu1 %v573_v35  ;;  %v1346_v35 = vld [vmem:[%s1997_s3] ss:$0 sm:$0xff] }
  0x27   : > { %1403 = vmatprep.subr.mxu1 %v588_v36 }
  0x28   : > { %1404 = vmatpush3.msra.mxu1 %v572_v37 }
  0x29   : > { %1465 = vmatpush3.bf16.msra.mxu0 %v1569_v28  ;;  %1405 = vmatprep.subr.mxu1 %v587_v38 }
  0x2a   : > { %1406 = vmatpush3.msra.mxu1 %v571_v39 }
  0x2b   : > { %1407 = vmatprep.subr.mxu1 %v586_v40  ;;  %v849_v40 = vld [vmem:[%s2003_s9 + $0x78] sm:$0xff] }
  0x2c   : > { %1467 = vmatmul.mubr.bf16.vlgmr.msra.gmra.mxu0 %v1570_v31  ;;  %1408 = vmatpush3.msra.mxu1 %v570_v41  ;;  %v848_v41 = vld [vmem:[%s2003_s9 + $0x70] sm:$0xff] }
  0x2d   : > { %757 = vmatprep.subr.mxu1 %v603_v2  ;;  %1490 = vmatprep.subr.mxu0 %v849_v40 }
  0x2e   : > { %1491 = vmatpush3.msra.mxu0 %v849_v40 }
  0x2f   : > { %1492 = vmatprep.subr.mxu0 %v848_v41 }
  0x30   : > { %1493 = vmatpush3.msra.mxu0 %v848_v41 }
  0xec   : > { %v558_v43 = vpop.f32.mrf.mxu0 }
  0xed   : > { %v559_v44 = vadd.f32 %v1334_v42, %v558_v43  ;;  %v846_v43 = vld [vmem:[%s2003_s9 + $0x60] sm:$0xff] }
  0xee   : > { %v1468_v45 = vpop.f32.mrf.mxu0 }
  0xef   : > { %v565_v46 = vmul.f32 0.2, %v559_v44  ;;  %v844_v45 = vld [vmem:[%s2003_s9 + $0x50] sm:$0xff] }
  0xf0   : > { %v561_v47 = vpop.f32.mrf.mxu0 }
  0xf1   : > { %v1826_v48 = vmax.f32 %v559_v44, %v565_v46  ;;  %v562_v49 = vadd.f32 %v1334_v42, %v561_v47  ;;  %v847_v42 = vld [vmem:[%s2003_s9 + $0x68] sm:$0xff]  ;;  %v845_v44 = vld [vmem:[%s2003_s9 + $0x58] sm:$0xff]  ;;  %v842_v47 = vld [vmem:[%s2003_s9 + $0x40] sm:$0xff] }
  0xf2   : > { %v1469_v50 = vpop.f32.mrf.mxu0  ;;  %1494 = vmatprep.subr.mxu0 %v847_v42  ;;  %v843_v46 = vld [vmem:[%s2003_s9 + $0x48] sm:$0xff] }
  0xf3   : > { %v566_v51 = vmul.f32 0.2, %v562_v49  ;;  %v604_v52 = vmul.f32 %v1826_v48, %v1826_v48  ;;  %1495 = vmatpush3.msra.mxu0 %v847_v42  ;;  %v839_v50 = vld [vmem:[%s2003_s9 + $0x28] sm:$0xff] }
  0xf4   : > { %1496 = vmatprep.subr.mxu0 %v846_v43 }
  0xf5   : > { %v1830_v53 = vmax.f32 %v562_v49, %v566_v51  ;;  %670 = vmatprep.mubr.f32.mxu1 %v604_v52  ;;  %1497 = vmatpush3.msra.mxu0 %v846_v43  ;;  %v840_v49 = vld [vmem:[%s2003_s9 + $0x30] sm:$0xff]  ;;  %v838_v51 = vld [vmem:[%s2003_s9 + $0x20] sm:$0xff]  ;;  %v837_v52 = vld [vmem:[%s2003_s9 + $0x18] sm:$0xff] }
  0xf6   : > { %671 = vmatmul.mubr.f32.vlgmr.msra.gmra.mxu1 %v1826_v48  ;;  %1498 = vmatprep.subr.mxu0 %v845_v44 }
  0xf7   : > { %v605_v54 = vmul.f32 %v1830_v53, %v1830_v53  ;;  %758 = vmatpush1.msra.mxu1 %v602_v3  ;;  %1499 = vmatpush3.msra.mxu0 %v845_v44 }
  0xf8   : > { %1470 = vmatprep.subr.bf16.mxu1 %v1599_v1  ;;  %1500 = vmatprep.subr.mxu0 %v844_v45 }
  0xf9   : > { %675 = vmatprep.mubr.f32.mxu1 %v605_v54  ;;  %1501 = vmatpush3.msra.mxu0 %v844_v45  ;;  %v1347_v54 = vld [vmem:[%s1999_s5] ss:$0 sm:$0xff] }
  0xfa   : > { %676 = vmatmul.mubr.f32.gmra.mxu1 %v1830_v53  ;;  %1502 = vmatprep.subr.mxu0 %v843_v46 }
  0xfb   : > { %791 = vmatprep.mubr.f32.mxu1 %v1599_v1  ;;  %1503 = vmatpush3.msra.mxu0 %v843_v46 }
  0xfc   : > { %1504 = vmatprep.subr.mxu0 %v842_v47 }
  0xfd   : > { %1505 = vmatpush3.msra.mxu0 %v842_v47 }
 0x1b6   : > { %v1409_v55 = vpop.f32.mrf.mxu1 }
 0x1b8   : > { %v1410_v56 = vpop.f32.mrf.mxu1 }
 0x1b9   : > { %v1411_v57 = vadd.f32 %v1410_v56, %v1409_v55 }
 0x1ba   : > { %v1412_v58 = vpop.f32.mrf.mxu1 }
 0x1bb   : > { %v681_v59 = vmul.f32 0.03125, %v1411_v57  ;;  %v835_v57 = vld [vmem:[%s2003_s9 + $0x8] sm:$0xff] }
 0x1bc   : > { %v1413_v60 = vpop.f32.mrf.mxu1 }
 0x1bd   : > { %v1414_v61 = vadd.f32 %v1413_v60, %v1412_v58  ;;  %711 = vrot.lane.b32.xlu1 %v681_v59, %s1601_s26  ;;  %v683_v62 = vmul.f32 %v681_v59, %v681_v59 }
 0x1bf   : > { %v682_v63 = vmul.f32 0.03125, %v1414_v61  ;;  %687 = vrot.lane.b32.xlu0 %v683_v62, %s1601_s26 }
 0x1c1   : > { %v684_v0 = vmul.f32 %v682_v63, %v682_v63 }
 0x1c3   : > { %689 = vrot.lane.b32.xlu0 %v684_v0, %s1601_s26 }
 0x22f   : > { %v712_v14 = vpop.permute.xlu1 %711 }
 0x231   : > { %v688_v4 = vpop.permute.xlu0 %687 }
 0x232   : > { %v693_v5 = vsub.f32 %v681_v59, %v688_v4  ;;  %v834_v59 = vld [vmem:[%s2003_s9] sm:$0xff] }
 0x234   : > { %v695_v6 = vmax.f32 %v693_v5, 0.0 }
 0x235   : > { %v690_v7 = vpop.permute.xlu0 %689 }
 0x236   : > { %v697_v8 = vadd.f32 1e-05, %v695_v6  ;;  %v694_v9 = vsub.f32 %v682_v63, %v690_v7 }
 0x238   : > { %1583 = vrsqrt.f32 %v697_v8  ;;  %v696_v10 = vmax.f32 %v694_v9, 0.0 }
 0x23a   : > { %v698_v11 = vadd.f32 1e-05, %v696_v10 }
 0x23c   : > { %1585 = vrsqrt.f32 %v698_v11 }
 0x245   : > { %v1584_v12 = vpop.eup %1583 }
 0x246   : > { %703 = vrot.lane.b32.xlu1 %v1584_v12, %s1602_s15 }
 0x249   : > { %v1586_v13 = vpop.eup %1585 }
 0x24a   : > { %713 = vrot.lane.b32.xlu1 %v682_v63, %s1601_s26  ;;  %705 = vrot.lane.b32.xlu0 %v1586_v13, %s1602_s15 }
 0x2b8   : > { %v704_v16 = vpop.permute.xlu1 %703 }
 0x2b9   : > { %v718_v17 = vsel %vm717_vm1, %v704_v16, %v712_v14 }
 0x2ba   : > { %1344 = vmatmul.mubr.msk.f32.vlgmr.msra.gmra.mxu1 %vm720_vm2, %v718_v17 }
 0x2bb   : > { %797 = vmatprep.mubr.f32.mxu1 %v1599_v1  ;;  %1471 = vmatpush3.bf16.msra.mxu1 %v1571_v15 }
 0x2bc   : > { %v714_v19 = vpop.permute.xlu1 %713  ;;  %v706_v20 = vpop.permute.xlu0 %705  ;;  %1472 = vmatprep.subr.bf16.mxu1 %v1599_v1 }
 0x2bd   : > { %v719_v21 = vsel %vm717_vm1, %v706_v20, %v714_v19 }
 0x2be   : > { %1345 = vmatmul.mubr.msk.f32.gmra.mxu1 %vm720_vm2, %v719_v21 }
 0x2bf   : > { %1473 = vmatpush3.bf16.msra.mxu1 %v1572_v18  ;;  %1486 = vmatprep.mubr.msk.bf16.mxu1 %vm1600_vm0, %v1599_v1  ;;  %v850_v18 = vld [vmem:[%s2004_s10] sm:$0xf] }
 0x2c0   : > { %1474 = vmatprep.subr.bf16.mxu1 %v1599_v1 }
 0x2c3   : > { %1475 = vmatpush3.bf16.msra.mxu1 %v1573_v22 }
 0x2c4   : > { %1476 = vmatprep.subr.bf16.mxu1 %v1599_v1 }
 0x2c7   : > { %1477 = vmatpush3.bf16.msra.mxu1 %v1574_v23 }
 0x2c8   : > { %1478 = vmatprep.subr.bf16.mxu1 %v1599_v1 }
 0x2cb   : > { %1479 = vmatpush3.bf16.msra.mxu1 %v1575_v24 }
 0x2cc   : > { %1480 = vmatprep.subr.bf16.mxu1 %v1599_v1 }
 0x2cf   : > { %1481 = vmatpush3.bf16.msra.mxu1 %v1576_v25 }
 0x2d0   : > { %1482 = vmatprep.subr.bf16.mxu1 %v1599_v1 }
 0x2d3   : > { %1483 = vmatpush3.bf16.msra.mxu1 %v1577_v26 }
 0x2d4   : > { %1484 = vmatprep.subr.bf16.mxu1 %v1599_v1 }
 0x2d7   : > { %1485 = vmatpush3.bf16.msra.mxu1 %v1578_v27 }
 0x2d8   : > { %1525 = vmatprep.subr.msk.mxu1 %vm1084_vm4, %v850_v18 }
 0x37a   : > { %v793_v28 = vpop.f32.mrf.mxu1 }
 0x37c   : > { %v795_v29 = vpop.f32.mrf.mxu1 }
 0x37d   : > { %v804_v30 = vsub.f32 %v1826_v48, %v795_v29  ;;  %v841_v48 = vld [vmem:[%s2003_s9 + $0x38] sm:$0xff] }
 0x37e   : > { %v799_v31 = vpop.f32.mrf.mxu1  ;;  %1506 = vmatprep.subr.mxu0 %v841_v48 }
 0x37f   : > { %v806_v33 = vmul.f32 %v804_v30, %v793_v28  ;;  %1507 = vmatpush3.msra.mxu0 %v841_v48 }
 0x380   : > { %v801_v32 = vpop.f32.mrf.mxu1  ;;  %1508 = vmatprep.subr.mxu0 %v840_v49 }
 0x381   : > { %v805_v34 = vsub.f32 %v1830_v53, %v801_v32  ;;  %v814_v37 = vadd.f32 %v1346_v35, %v806_v33  ;;  %1509 = vmatpush3.msra.mxu0 %v840_v49  ;;  %v836_v53 = vld [vmem:[%s2003_s9 + $0x10] sm:$0xff] }
 0x382   : > { %1510 = vmatprep.subr.mxu0 %v839_v50 }
 0x383   : > { %v807_v36 = vmul.f32 %v805_v34, %v799_v31  ;;  %1511 = vmatpush3.msra.mxu0 %v839_v50  ;;  %v1360_v50 = vld [vmem:[%s2002_s8] ss:$0 sm:$0xff] }
 0x384   : > { %1512 = vmatprep.subr.mxu0 %v838_v51 }
 0x385   : > { %v815_v38 = vadd.f32 %v1346_v35, %v807_v36  ;;  %1513 = vmatpush3.msra.mxu0 %v838_v51  ;;  %v1579_v35 = vld [vmem:[%s2001_s7 + $0x18] sm:$0xff]   ;;  %v1580_v36 = vld [vmem:[%s2001_s7 + $0x10] sm:$0xff]  }
 0x386   : > { %1514 = vmatprep.subr.mxu0 %v837_v52 }
 0x387   : > { %v851_v39 = vpack.c.bf16 %v815_v38, %v814_v37  ;;  %1515 = vmatpush3.msra.mxu0 %v837_v52  ;;  %v1581_v37 = vld [vmem:[%s2001_s7 + $0x8] sm:$0xff]   ;;  %v1582_v38 = vld [vmem:[%s2001_s7] sm:$0xff]  }
 0x388   : > { %1516 = vmatprep.subr.mxu0 %v836_v53 }
 0x389   : > { %1487 = vmatmul.mubr.bf16.vlgmr.msra.gmra.mxu1 %v851_v39  ;;  %1517 = vmatpush3.msra.mxu0 %v836_v53 }
 0x38a   : > { %1518 = vmatprep.subr.mxu0 %v835_v57  ;;  %1526 = vmatpush3.msk.msra.mxu1 %vm1084_vm4, %v850_v18 }
 0x38b   : > { %1519 = vmatpush3.msra.mxu0 %v835_v57 }
 0x38c   : > { %1520 = vmatprep.subr.mxu0 %v834_v59 }
 0x38d   : > { %1521 = vmatpush3.msra.mxu0 %v834_v59 }
 0x38e   : > { %1530 = vmatprep.subr.bf16.mxu0 %v1599_v1 }
 0x449   : > { %v940_v55 = vpop.f32.mrf.mxu1 }
 0x44a   : > { %v941_v56 = vadd.f32 %v1347_v54, %v940_v55 }
 0x44b   : > { %v1488_v58 = vpop.f32.mrf.mxu1 }
 0x44c   : > { %v947_v60 = vmul.f32 0.2, %v941_v56 }
 0x44d   : > { %v943_v61 = vpop.f32.mrf.mxu1 }
 0x44e   : > { %v944_v62 = vadd.f32 %v1347_v54, %v943_v61  ;;  %v1939_v0 = vmax.f32 %v941_v56, %v947_v60 }
 0x44f   : > { %v1489_v63 = vpop.f32.mrf.mxu1 }
 0x450   : > { %v948_v2 = vmul.f32 0.2, %v944_v62  ;;  %v951_v4 = vmul.f32 %v1939_v0, %v1939_v0 }
 0x452   : > { %v1941_v3 = vmax.f32 %v944_v62, %v948_v2 }
 0x454   : > { %v952_v5 = vmul.f32 %v1941_v3, %v1941_v3 }
 0x456   : > { %v1557_v6 = vpack.i.bf16 %v952_v5, %v951_v4 }
 0x458   : > { %1558 = vrot.lane.b32.xlu0 %v1557_v6, %s1603_s24 }
 0x4ca   : > { %v1559_v7 = vpop.permute.xlu0 %1558 }
 0x4cb   : > { %v1561_v8 = vunpack.i.h.bf16 %v1559_v7  ;;  %v1560_v9 = vunpack.i.l.bf16 %v1559_v7 }
 0x4cd   : > { %v962_v10 = vsel %vm961_vm3, %v1939_v0, %v1560_v9  ;;  %v963_v11 = vsel %vm961_vm3, %v1941_v3, %v1561_v8 }
 0x4ce   : > { %1522 = vmatprep.mubr.f32.mxu0 %v962_v10 }
 0x4cf   : > { %1523 = vmatmul.mubr.f32.vlgmr.msra.gmra.mxu0 %v963_v11 }
 0x4d0   : > { %1538 = vmatprep.mubr.msk.bf16.mxu0 %vm1600_vm0, %v1599_v1  ;;  %1531 = vmatpush3.bf16.msra.mxu0 %v1579_v35 }
 0x4d1   : > { %1532 = vmatprep.subr.bf16.mxu0 %v1599_v1 }
 0x4d4   : > { %1533 = vmatpush3.bf16.msra.mxu0 %v1580_v36 }
 0x4d5   : > { %1534 = vmatprep.subr.bf16.mxu0 %v1599_v1 }
 0x4d8   : > { %1535 = vmatpush3.bf16.msra.mxu0 %v1581_v37 }
 0x4d9   : > { %1536 = vmatprep.subr.bf16.mxu0 %v1599_v1  ;;  %v1359_v1 = vld [vmem:[%s2000_s6] ss:$0 sm:$0xff] }
 0x4dc   : > { %1537 = vmatpush3.bf16.msra.mxu0 %v1582_v38 }
 0x58f   : > { %v1524_v12 = vpop.f32.mrf.mxu0 }
 0x590   : > { %v1040_v13 = vmul.f32 0.03125, %v1524_v12 }
 0x591   : > { %v1030_v14 = vpop.f32.mrf.mxu0 }
 0x592   : > { %v1039_v15 = vmul.f32 0.03125, %v1030_v14  ;;  %v1042_v16 = vmul.f32 %v1040_v13, %v1040_v13 }
 0x594   : > { %1047 = vrot.lane.b32.xlu0 %v1042_v16, %s1604_s20  ;;  %v1041_v17 = vmul.f32 %v1039_v15, %v1039_v15 }
 0x596   : > { %1045 = vrot.lane.b32.xlu1 %v1041_v17, %s1604_s20 }
 0x598   : > { %1069 = vrot.lane.b32.xlu0 %v1039_v15, %s1604_s20 }
 0x59c   : > { %1071 = vrot.lane.b32.xlu0 %v1040_v13, %s1604_s20  ;;  %s1333_s20 = sshll.u32 %s2009_s14, 3 }
 0x59d   : > { %s442_s29 = scalar_lea.vmem %s2007_s13, %s1333_s20 }
 0x606   : > { %v1048_v19 = vpop.permute.xlu0 %1047 }
 0x607   : > { %v1052_v20 = vsub.f32 %v1040_v13, %v1048_v19 }
 0x608   : > { %v1046_v21 = vpop.permute.xlu1 %1045 }
 0x609   : > { %v1051_v22 = vsub.f32 %v1039_v15, %v1046_v21  ;;  %v1054_v23 = vmax.f32 %v1052_v20, 0.0 }
 0x60a   : > { %v1070_v29 = vpop.permute.xlu0 %1069 }
 0x60b   : > { %v1053_v24 = vmax.f32 %v1051_v22, 0.0  ;;  %v1056_v26 = vadd.f32 1e-05, %v1054_v23 }
 0x60d   : > { %v1055_v25 = vadd.f32 1e-05, %v1053_v24 }
 0x60e   : > { %v1072_v32 = vpop.permute.xlu0 %1071 }
 0x60f   : > { %1587 = vrsqrt.f32 %v1055_v25 }
 0x610   : > { %1589 = vrsqrt.f32 %v1056_v26 }
 0x61c   : > { %v1588_v27 = vpop.eup %1587 }
 0x61d   : > { %1061 = vrot.lane.b32.xlu1 %v1588_v27, %s1605_s28  ;;  %v1590_v28 = vpop.eup %1589 }
 0x621   : > { %1063 = vrot.lane.b32.xlu1 %v1590_v28, %s1605_s28 }
 0x68f   : > { %v1062_v30 = vpop.permute.xlu1 %1061 }
 0x690   : > { %v1076_v31 = vsel %vm1075_vm5, %v1062_v30, %v1070_v29 }
 0x691   : > { %1527 = vmatprep.mubr.msk.f32.mxu1 %vm717_vm1, %v1076_v31 }
 0x693   : > { %v1064_v33 = vpop.permute.xlu1 %1063 }
 0x694   : > { %v1077_v34 = vsel %vm1075_vm5, %v1064_v33, %v1072_v32 }
 0x695   : > { %1528 = vmatmul.mubr.msk.f32.vlgmr.msra.gmra.mxu1 %vm717_vm1, %v1077_v34 }
 0x755   : > { %v1529_v39 = vpop.f32.mrf.mxu1 }
 0x756   : > { %1167 = vrot.lane.b32.xlu0 %v1529_v39, %s1603_s24 }
 0x757   : > { %v1154_v40 = vpop.f32.mrf.mxu1 }
 0x758   : > { %1165 = vrot.lane.b32.xlu1 %v1154_v40, %s1603_s24 }
 0x7c8   : > { %v1168_v41 = vpop.permute.xlu0 %1167 }
 0x7c9   : > { %v1172_v42 = vsub.f32 %v1941_v3, %v1168_v41 }
 0x7ca   : > { %v1166_v43 = vpop.permute.xlu1 %1165 }
 0x7cb   : > { %v1174_v44 = vmul.f32 %v1529_v39, %v1172_v42  ;;  %v1171_v45 = vsub.f32 %v1939_v0, %v1166_v43 }
 0x7cd   : > { %v1173_v46 = vmul.f32 %v1171_v45, %v1154_v40  ;;  %v1182_v47 = vadd.f32 %v1359_v1, %v1174_v44 }
 0x7cf   : > { %v1181_v48 = vadd.f32 %v1359_v1, %v1173_v46 }
 0x7d1   : > { %v1183_v49 = vpack.c.bf16 %v1182_v47, %v1181_v48 }
 0x7d3   : > { %1539 = vmatmul.mubr.msk.bf16.vlgmr.msra.gmra.mxu0 %vm961_vm3, %v1183_v49 }
 0x893   : > { %v1260_v51 = vpop.f32.mrf.mxu0 }
 0x894   : > { %v1261_v52 = vadd.f32 %v1360_v50, %v1260_v51 }
 0x895   : > { %v1540_v53 = vpop.f32.mrf.mxu0 }
 0x896   : > { %1267 = vst.msk [vmem:[%s442_s29] sm:$0xff] %vm720_vm2, %v1261_v52 }
 0x897   : > { %v1263_v54 = vpop.f32.mrf.mxu0 }
 0x898   : > { %v1264_v55 = vadd.f32 %v1360_v50, %v1263_v54 }
 0x899   : > { %v1541_v56 = vpop.f32.mrf.mxu0 }
 0x89a   : > { %1268 = vst.msk [vmem:[%s442_s29 + $0x8] sm:$0xff] %vm720_vm2, %v1264_v55 }
 0x89b PF: > { %s23_s25 = sadd.s32 1, %s1597_s25  }
 0x89c   : > { %p20_p4 = scmp.ge.s32.totalorder %s23_s25, 5  }
 0x89e   :  { %22 = sbr.rel (!%p20_p4) target bundleno = 1 (0x1), region = 102 }

// kernel: pointnet_forward.2
= control target key start
LH: loop header
LB: loop body
LE: loop exit
PB: predicated region body
PF: predicated region fallthrough
CT: control target
= control target key end

     0   :  { %s2731_s0 = inlined_call_operand.vmem [shape: f32[48,8], index: 0, kind: input, shape index: {}]   ;;  %s2732_s1 = inlined_call_operand.vmem [shape: bf16[8,32], index: 1, kind: input, shape index: {}]   ;;  %s2733_s2 = inlined_call_operand.vmem [shape: f32[1,32], index: 2, kind: input, shape index: {}]   ;;  %s2734_s3 = inlined_call_operand.vmem [shape: f32[1,32], index: 3, kind: input, shape index: {}]   ;;  %s2735_s4 = inlined_call_operand.vmem [shape: f32[1,32], index: 4, kind: input, shape index: {}]   ;;  %s2736_s5 = inlined_call_operand.vmem [shape: bf16[32,64], index: 5, kind: input, shape index: {}]   ;;  %s2737_s6 = inlined_call_operand.vmem [shape: f32[1,64], index: 6, kind: input, shape index: {}]   ;;  %s2738_s7 = inlined_call_operand.vmem [shape: f32[1,64], index: 7, kind: input, shape index: {}]   ;;  %s2739_s8 = inlined_call_operand.vmem [shape: bf16[64,128], index: 8, kind: input, shape index: {}]   ;;  %s2740_s9 = inlined_call_operand.vmem [shape: f32[1,128], index: 9, kind: input, shape index: {}]   ;;  %s2741_s10 = inlined_call_operand.vmem [shape: f32[1,128], index: 10, kind: input, shape index: {}]   ;;  %s2742_s11 = inlined_call_operand.vmem [shape: bf16[128,128], index: 11, kind: input, shape index: {}]   ;;  %s2743_s12 = inlined_call_operand.vmem [shape: f32[1,128], index: 12, kind: input, shape index: {}]   ;;  %s2744_s13 = inlined_call_operand.vmem [shape: f32[1,128], index: 13, kind: input, shape index: {}]   ;;  %s2745_s14 = inlined_call_operand.vmem [shape: f32[128,4], index: 14, kind: input, shape index: {}]   ;;  %s2746_s15 = inlined_call_operand.vmem [shape: f32[4,128], index: 15, kind: input, shape index: {}]   ;;  %s2747_s16 = inlined_call_operand.vmem [shape: f32[256,8], index: 16, kind: input, shape index: {}]   ;;  %s2748_s17 = inlined_call_operand.vmem [shape: f32[8,256], index: 17, kind: input, shape index: {}]   ;;  %s2749_s18 = inlined_call_operand.vmem [shape: f32[8,256], index: 18, kind: input, shape index: {}]   ;;  %s2750_s19 = inlined_call_operand.vmem [shape: bf16[48,128], index: 19, kind: output, shape index: {0}]   ;;  %s2751_s20 = inlined_call_operand.vmem [shape: f32[24,128], index: 20, kind: output, shape index: {1}]  }
   0x1   :  { %2752 = sst [smem:[#allocation2_spill]] %s2731_s0 }
   0x2   :  { %2753 = sst [smem:[#allocation3_spill]] %s2732_s1  ;;  %s2290_s1 = smov 0  }
   0x3   :  { %2754 = sst [smem:[#allocation4_spill]] %s2733_s2 }
   0x4   :  { %2755 = sst [smem:[#allocation5_spill]] %s2734_s3 }
   0x5   :  { %2756 = sst [smem:[#allocation6_spill]] %s2735_s4 }
   0x6 LB: > { %s2296_s22 = sadd.s32 4294967295, %s2176_s1   ;;  %p1865_p0 = scmp.ge.s32.totalorder %s2176_s1, 1  ;;  %s2176_s1 = sphi %s2290_s1, %s31_s1  }
   0x7   : > { %p566_p1 = scmp.lt.s32.totalorder %s2176_s1, 4 }
   0x9   : > { %p567_p2 = pnand %p1865_p0, %p566_p1 }
   0xa   : > { %s2757_s2 = sld [smem:[#allocation3_spill]] (!%p567_p2)  ;;  %s1866_s25 = sshll.u32 (!%p567_p2), %s2296_s22, 1 }
   0xb   : > { %570 = sbr.rel (%p567_p2) target bundleno = 3234 (0xca2), region = 96  ;;  %p629_p3 = scmp.lt.s32.totalorder (!%p567_p2), %s1866_s25, 5 }
   0xc   : > { %s2758_s28 = sld [smem:[#allocation2_spill]] (!%p567_p2)  ;;  %s2182_s21 = smov (!%p567_p2), 126  }
   0xd   : > { %s2759_s0 = sld [smem:[#allocation4_spill]] (!%p567_p2)  ;;  %s2183_s26 = smov (!%p567_p2), 4  }
   0xe   : > { %s2760_s27 = sld [smem:[#allocation5_spill]] (!%p567_p2)  ;;  %p640_p4 = scmp.lt.s32.totalorder (!%p567_p2), %s2296_s22, 2 }
   0xf   : > { %s2761_s29 = sld [smem:[#allocation6_spill]] (!%p567_p2) }
  0x10   : > { %v648_v0 = vld [vmem:[%s2757_s2] sm:$0xf]  ;;  %vm660_vm0 = vcmask 1043456   ;;  %v2178_v1 = vmov 0.0   ;;  %vm2179_vm1 = vmmov 0   ;;  %s2763_s25 = smov (!%p629_p3, %s1866_s25), 5 }
  0x11   : > { %2032 = vmatprep.subr.bf16.mxu0 %v2178_v1  ;;  %v662_v2 = vsel %vm660_vm0, %v648_v0, 0  ;;  %2034 = vmatprep.mubr.msk.bf16.mxu0 %vm2179_vm1, %v2178_v1  ;;  %s1867_s3 = sshll.u32 %s2763_s25, 3  ;;  %vm656_vm2 = vcmask 64512   ;;  %vm711_vm3 = vcmask 261120   ;;  %v2140_v23 = vld [vmem:[%s2736_s5 + $0x8] sm:$0xff]   ;;  %v2141_v24 = vld [vmem:[%s2736_s5] sm:$0xff]  }
  0x12   : > { %2033 = vmatpush3.bf16.msra.mxu0 %v662_v2  ;;  %s632_s4 = scalar_lea.vmem %s2758_s28, %s1867_s3  ;;  %v782_v54 = vld [vmem:[%s2745_s14 + $0x78] sm:$0xff]  ;;  %v781_v55 = vld [vmem:[%s2745_s14 + $0x70] sm:$0xff]  ;;  %v780_v56 = vld [vmem:[%s2745_s14 + $0x68] sm:$0xff]  ;;  %vm861_vm4 = vcmask 523264   ;;  %vm975_vm5 = vcmask 15360   ;;  %vm978_vm6 = vcmask 31744  }
  0x13   : > { %2038 = vmatprep.subr.bf16.mxu0 %v2178_v1  ;;  %v645_v3 = vld [vmem:[%s632_s4] sm:$0xff]  ;;  %v646_v4 = vld [vmem:[%s632_s4 + $0x8] sm:$0xff]  ;;  %v778_v58 = vld [vmem:[%s2745_s14 + $0x58] sm:$0xff]  ;;  %s2180_s4 = smov 64   ;;  %s1906_s28 = sshll.u32 %s2296_s22, 4 }
  0x14   : > { %v647_v5 = vpack.c.bf16 %v646_v4, %v645_v3  ;;  %v1871_v6 = vld [vmem:[%s2759_s0] ss:$0 sm:$0xff]  ;;  %v777_v59 = vld [vmem:[%s2745_s14 + $0x50] sm:$0xff]  ;;  %v776_v60 = vld [vmem:[%s2745_s14 + $0x48] sm:$0xff]  ;;  %s2184_s0 = smov 124   ;;  %s2765_s22 = smov (!%p640_p4, %s2296_s22), 2 }
  0x15   : > { %v1873_v41 = vld [vmem:[%s2760_s27] ss:$0 sm:$0xff]  ;;  %v774_v62 = vld [vmem:[%s2745_s14 + $0x38] sm:$0xff]  ;;  %v773_v63 = vld [vmem:[%s2745_s14 + $0x30] sm:$0xff] }
  0x16   : > { %2035 = vmatmul.mubr.msk.bf16.vlgmr.msra.gmra.mxu0 %vm656_vm2, %v647_v5  ;;  %v1874_v49 = vld [vmem:[%s2761_s29] ss:$0 sm:$0xff]  ;;  %v772_v0 = vld [vmem:[%s2745_s14 + $0x28] sm:$0xff]  ;;  %v770_v3 = vld [vmem:[%s2745_s14 + $0x18] sm:$0xff]  ;;  %s2181_s29 = smov 2  }
  0x17   : > { %2042 = vmatprep.mubr.msk.bf16.mxu0 %vm2179_vm1, %v2178_v1  ;;  %2039 = vmatpush3.bf16.msra.mxu0 %v2140_v23  ;;  %v779_v57 = vld [vmem:[%s2745_s14 + $0x60] sm:$0xff]  ;;  %v769_v4 = vld [vmem:[%s2745_s14 + $0x10] sm:$0xff] }
  0x18   : > { %2040 = vmatprep.subr.bf16.mxu0 %v2178_v1  ;;  %v775_v61 = vld [vmem:[%s2745_s14 + $0x40] sm:$0xff] }
  0x19   : > { %v771_v2 = vld [vmem:[%s2745_s14 + $0x20] sm:$0xff] }
  0x1a   : > { %v1875_v5 = vld [vmem:[%s2737_s6] ss:$0 sm:$0xff] }
  0x1b   : > { %2041 = vmatpush3.bf16.msra.mxu0 %v2141_v24 }
  0x1c   : > { %2046 = vmatprep.subr.mxu0 %v782_v54 }
  0xd6   : > { %v698_v7 = vpop.f32.mrf.mxu0 }
  0xd7   : > { %v699_v8 = vadd.f32 %v1871_v6, %v698_v7 }
  0xd8   : > { %v2036_v9 = vpop.f32.mrf.mxu0 }
  0xd9   : > { %v705_v10 = vmul.f32 0.2, %v699_v8 }
  0xda   : > { %v701_v11 = vpop.f32.mrf.mxu0 }
  0xdb   : > { %v707_v12 = vmax.f32 %v699_v8, %v705_v10  ;;  %v702_v13 = vadd.f32 %v1871_v6, %v701_v11  ;;  %v768_v8 = vld [vmem:[%s2745_s14 + $0x8] sm:$0xff]  ;;  %v767_v10 = vld [vmem:[%s2745_s14] sm:$0xff] }
  0xdc   : > { %v2037_v14 = vpop.f32.mrf.mxu0 }
  0xdd   : > { %v706_v15 = vmul.f32 0.2, %v702_v13  ;;  %v712_v16 = vsel %vm711_vm3, %v707_v12, 0.0  ;;  %v721_v17 = vmul.f32 %v707_v12, %v707_v12 }
  0xde   : > { %713 = vadd.xlane.f32.xlu0 %v712_v16 }
  0xdf   : > { %v708_v18 = vmax.f32 %v702_v13, %v706_v15  ;;  %v723_v19 = vsel %vm711_vm3, %v721_v17, 0.0 }
  0xe0   : > { %724 = vadd.xlane.f32.xlu1 %v723_v19 }
  0xe1   : > { %v715_v20 = vsel %vm711_vm3, %v708_v18, 0.0  ;;  %v722_v21 = vmul.f32 %v708_v18, %v708_v18 }
  0xe2   : > { %716 = vadd.xlane.f32.xlu0 %v715_v20 }
  0xe3   : > { %v726_v22 = vsel %vm711_vm3, %v722_v21, 0.0 }
  0xe4   : > { %727 = vadd.xlane.f32.xlu1 %v726_v22 }
 0x167   : > { %v714_v25 = vpop.xlane.xlu0 %713 }
 0x168   : > { %v719_v26 = vmul.f32 0.03125, %v714_v25 }
 0x169   : > { %v725_v27 = vpop.xlane.xlu1 %724 }
 0x16a   : > { %v731_v28 = vmul.f32 %v719_v26, %v719_v26  ;;  %v729_v29 = vmul.f32 0.03125, %v725_v27  ;;  %v737_v44 = vsub.f32 %v707_v12, %v719_v26 }
 0x16b   : > { %v717_v30 = vpop.xlane.xlu0 %716 }
 0x16c   : > { %v733_v31 = vsub.f32 %v729_v29, %v731_v28  ;;  %v720_v32 = vmul.f32 0.03125, %v717_v30 }
 0x16d   : > { %v728_v33 = vpop.xlane.xlu1 %727 }
 0x16e   : > { %v735_v34 = vmax.f32 %v733_v31, 0.0  ;;  %v732_v35 = vmul.f32 %v720_v32, %v720_v32  ;;  %v730_v36 = vmul.f32 0.03125, %v728_v33  ;;  %v738_v46 = vsub.f32 %v708_v18, %v720_v32 }
 0x170   : > { %v739_v37 = vadd.f32 1e-05, %v735_v34  ;;  %v734_v38 = vsub.f32 %v730_v36, %v732_v35 }
 0x172   : > { %2154 = vrsqrt.f32 %v739_v37  ;;  %v736_v39 = vmax.f32 %v734_v38, 0.0 }
 0x174   : > { %v740_v40 = vadd.f32 1e-05, %v736_v39 }
 0x176   : > { %2156 = vrsqrt.f32 %v740_v40  ;;  %v783_v40 = vld [vmem:[%s2746_s15] sm:$0xf] }
 0x177   : > { %2081 = vmatprep.subr.msk.mxu1 %vm660_vm0, %v783_v40 }
 0x178   : > { %2082 = vmatpush3.msk.msra.mxu1 %vm660_vm0, %v783_v40 }
 0x179   : > { %2086 = vmatprep.subr.bf16.mxu1 %v2178_v1 }
 0x17f   : > { %v2155_v42 = vpop.eup %2154 }
 0x180   : > { %v749_v43 = vmul.f32 %v2155_v42, %v1873_v41 }
 0x182   : > { %v751_v48 = vmul.f32 %v749_v43, %v737_v44 }
 0x183   : > { %v2157_v45 = vpop.eup %2156 }
 0x184   : > { %v750_v47 = vmul.f32 %v2157_v45, %v1873_v41  ;;  %v759_v51 = vadd.f32 %v1874_v49, %v751_v48 }
 0x186   : > { %v752_v50 = vmul.f32 %v750_v47, %v738_v46 }
 0x188   : > { %v760_v52 = vadd.f32 %v1874_v49, %v752_v50  ;;  %v2142_v49 = vld [vmem:[%s2739_s8 + $0x18] sm:$0xff]   ;;  %v2143_v50 = vld [vmem:[%s2739_s8 + $0x10] sm:$0xff]  }
 0x18a   : > { %v784_v53 = vpack.c.bf16 %v760_v52, %v759_v51  ;;  %v2144_v51 = vld [vmem:[%s2739_s8 + $0x8] sm:$0xff]   ;;  %v2145_v52 = vld [vmem:[%s2739_s8] sm:$0xff]  }
 0x18c   : > { %2043 = vmatmul.mubr.msk.bf16.vlgmr.msra.gmra.mxu0 %vm711_vm3, %v784_v53  ;;  %v2432_v53 = vld [vmem:[%s2747_s16 + $0xf8] sm:$0xff] }
 0x18d   : > { %2047 = vmatpush3.msra.mxu0 %v782_v54 }
 0x18e   : > { %2048 = vmatprep.subr.mxu0 %v781_v55 }
 0x18f   : > { %2049 = vmatpush3.msra.mxu0 %v781_v55 }
 0x190   : > { %2050 = vmatprep.subr.mxu0 %v780_v56 }
 0x191   : > { %2051 = vmatpush3.msra.mxu0 %v780_v56 }
 0x192   : > { %2052 = vmatprep.subr.mxu0 %v779_v57 }
 0x193   : > { %2053 = vmatpush3.msra.mxu0 %v779_v57 }
 0x194   : > { %2054 = vmatprep.subr.mxu0 %v778_v58 }
 0x195   : > { %2055 = vmatpush3.msra.mxu0 %v778_v58 }
 0x196   : > { %2056 = vmatprep.subr.mxu0 %v777_v59 }
 0x197   : > { %2057 = vmatpush3.msra.mxu0 %v777_v59 }
 0x198   : > { %2058 = vmatprep.subr.mxu0 %v776_v60 }
 0x199   : > { %2059 = vmatpush3.msra.mxu0 %v776_v60 }
 0x19a   : > { %2060 = vmatprep.subr.mxu0 %v775_v61 }
 0x19b   : > { %2061 = vmatpush3.msra.mxu0 %v775_v61  ;;  %v1882_v61 = vld [vmem:[%s2738_s7] ss:$0 sm:$0xff] }
 0x19c   : > { %2062 = vmatprep.subr.mxu0 %v774_v62 }
 0x19d   : > { %2063 = vmatpush3.msra.mxu0 %v774_v62 }
 0x19e   : > { %2064 = vmatprep.subr.mxu0 %v773_v63 }
 0x19f   : > { %2065 = vmatpush3.msra.mxu0 %v773_v63 }
 0x1a0   : > { %2066 = vmatprep.subr.mxu0 %v772_v0 }
 0x1a1   : > { %2067 = vmatpush3.msra.mxu0 %v772_v0 }
 0x1a2   : > { %2068 = vmatprep.subr.mxu0 %v771_v2 }
 0x1a3   : > { %2069 = vmatpush3.msra.mxu0 %v771_v2 }
 0x1a4   : > { %2070 = vmatprep.subr.mxu0 %v770_v3 }
 0x1a5   : > { %2071 = vmatpush3.msra.mxu0 %v770_v3  ;;  %v2445_v3 = vld [vmem:[%s2747_s16 + $0x78] sm:$0xff] }
 0x1a6   : > { %2072 = vmatprep.subr.mxu0 %v769_v4 }
 0x1a7   : > { %2073 = vmatpush3.msra.mxu0 %v769_v4  ;;  %v2450_v4 = vld [vmem:[%s2747_s16 + $0xf0] sm:$0xff] }
 0x1a8   : > { %2074 = vmatprep.subr.mxu0 %v768_v8 }
 0x1a9   : > { %2075 = vmatpush3.msra.mxu0 %v768_v8  ;;  %v2474_v8 = vld [vmem:[%s2747_s16 + $0xe0] sm:$0xff] }
 0x1aa   : > { %2076 = vmatprep.subr.mxu0 %v767_v10 }
 0x1ab   : > { %2077 = vmatpush3.msra.mxu0 %v767_v10  ;;  %v2486_v10 = vld [vmem:[%s2747_s16 + $0xd8] sm:$0xff] }
 0x24c   : > { %v840_v6 = vpop.f32.mrf.mxu0 }
 0x24d   : > { %v841_v7 = vadd.f32 %v1875_v5, %v840_v6  ;;  %v2462_v6 = vld [vmem:[%s2747_s16 + $0xe8] sm:$0xff] }
 0x24e   : > { %v2044_v9 = vpop.f32.mrf.mxu0 }
 0x24f   : > { %v847_v11 = vmul.f32 0.2, %v841_v7  ;;  %v2480_v9 = vld [vmem:[%s2747_s16 + $0x60] sm:$0xff] }
 0x250   : > { %v843_v12 = vpop.f32.mrf.mxu0 }
 0x251   : > { %v844_v13 = vadd.f32 %v1875_v5, %v843_v12  ;;  %v2390_v15 = vmax.f32 %v841_v7, %v847_v11  ;;  %v2456_v5 = vld [vmem:[%s2747_s16 + $0x70] sm:$0xff]  ;;  %v2468_v7 = vld [vmem:[%s2747_s16 + $0x68] sm:$0xff]  ;;  %v2492_v11 = vld [vmem:[%s2747_s16 + $0x58] sm:$0xff] }
 0x252   : > { %v2045_v14 = vpop.f32.mrf.mxu0  ;;  %v2498_v12 = vld [vmem:[%s2747_s16 + $0xd0] sm:$0xff] }
 0x253   : > { %v848_v16 = vmul.f32 0.2, %v844_v13  ;;  %v851_v18 = vmul.f32 %v2390_v15, %v2390_v15  ;;  %v2510_v14 = vld [vmem:[%s2747_s16 + $0xc8] sm:$0xff] }
 0x255   : > { %v2392_v17 = vmax.f32 %v844_v13, %v848_v16  ;;  %v2504_v13 = vld [vmem:[%s2747_s16 + $0x50] sm:$0xff]  ;;  %v2522_v16 = vld [vmem:[%s2747_s16 + $0xc0] sm:$0xff] }
 0x257   : > { %v852_v19 = vmul.f32 %v2392_v17, %v2392_v17 }
 0x259   : > { %v2135_v20 = vpack.i.bf16 %v852_v19, %v851_v18  ;;  %v2534_v18 = vld [vmem:[%s2747_s16 + $0xb8] sm:$0xff] }
 0x25a   : > { %v2540_v19 = vld [vmem:[%s2747_s16 + $0x38] sm:$0xff] }
 0x25b   : > { %2136 = vrot.lane.b32.xlu0 %v2135_v20, %s2180_s4  ;;  %v2546_v20 = vld [vmem:[%s2747_s16 + $0xb0] sm:$0xff] }
 0x2cd   : > { %v2137_v21 = vpop.permute.xlu0 %2136 }
 0x2ce   : > { %v2139_v22 = vunpack.i.h.bf16 %v2137_v21  ;;  %v2138_v23 = vunpack.i.l.bf16 %v2137_v21  ;;  %v2552_v21 = vld [vmem:[%s2747_s16 + $0x30] sm:$0xff] }
 0x2d0   : > { %v862_v24 = vsel %vm861_vm4, %v2390_v15, %v2138_v23  ;;  %v863_v25 = vsel %vm861_vm4, %v2392_v17, %v2139_v22  ;;  %v1114_v22 = vld [vmem:[%s2747_s16 + $0xa8] sm:$0xff] }
 0x2d1   : > { %2078 = vmatprep.mubr.f32.mxu0 %v862_v24  ;;  %v1098_v23 = vld [vmem:[%s2747_s16 + $0x28] sm:$0xff]  ;;  %v1113_v24 = vld [vmem:[%s2747_s16 + $0xa0] sm:$0xff] }
 0x2d2   : > { %2079 = vmatmul.mubr.f32.vlgmr.msra.gmra.mxu0 %v863_v25  ;;  %v1097_v25 = vld [vmem:[%s2747_s16 + $0x20] sm:$0xff] }
 0x2d3   : > { %1391 = vmatprep.mubr.f32.mxu0 %v2178_v1 }
 0x392   : > { %v2080_v26 = vpop.f32.mrf.mxu0 }
 0x393   : > { %v940_v29 = vmul.f32 0.03125, %v2080_v26  ;;  %v1112_v26 = vld [vmem:[%s2747_s16 + $0x98] sm:$0xff] }
 0x394   : > { %v930_v27 = vpop.f32.mrf.mxu0 }
 0x395   : > { %v939_v28 = vmul.f32 0.03125, %v930_v27  ;;  %v942_v31 = vmul.f32 %v940_v29, %v940_v29  ;;  %v1096_v27 = vld [vmem:[%s2747_s16 + $0x18] sm:$0xff] }
 0x397   : > { %969 = vrot.lane.b32.xlu0 %v939_v28, %s2181_s29  ;;  %v941_v30 = vmul.f32 %v939_v28, %v939_v28 }
 0x399   : > { %945 = vrot.lane.b32.xlu1 %v941_v30, %s2181_s29  ;;  %v1110_v30 = vld [vmem:[%s2747_s16 + $0x88] sm:$0xff] }
 0x39b   : > { %971 = vrot.lane.b32.xlu0 %v940_v29, %s2181_s29 }
 0x39d   : > { %947 = vrot.lane.b32.xlu1 %v942_v31, %s2181_s29  ;;  %v1094_v31 = vld [vmem:[%s2747_s16 + $0x8] sm:$0xff]  ;;  %s1869_s29 = sshll.u32 %s2763_s25, 2 }
 0x39e   : > { %s638_s23 = scalar_lea.vmem %s2750_s19, %s1869_s29  ;;  %s1870_s29 = sshll.u32 %s2765_s22, 3 }
 0x409   : > { %v970_v43 = vpop.permute.xlu0 %969 }
 0x40b   : > { %v946_v32 = vpop.permute.xlu1 %945 }
 0x40c   : > { %v951_v33 = vsub.f32 %v939_v28, %v946_v32  ;;  %v1111_v28 = vld [vmem:[%s2747_s16 + $0x90] sm:$0xff]  ;;  %v1109_v32 = vld [vmem:[%s2747_s16 + $0x80] sm:$0xff] }
 0x40d   : > { %v972_v46 = vpop.permute.xlu0 %971 }
 0x40e   : > { %v953_v34 = vmax.f32 %v951_v33, 0.0  ;;  %v1093_v33 = vld [vmem:[%s2747_s16] sm:$0xff] }
 0x40f   : > { %v948_v35 = vpop.permute.xlu1 %947 }
 0x410   : > { %v955_v36 = vadd.f32 1e-05, %v953_v34  ;;  %v952_v37 = vsub.f32 %v940_v29, %v948_v35  ;;  %v1095_v29 = vld [vmem:[%s2747_s16 + $0x10] sm:$0xff]  ;;  %v1883_v34 = vld [vmem:[%s2740_s9] ss:$0 sm:$0xff] }
 0x412   : > { %2158 = vrsqrt.f32 %v955_v36  ;;  %v954_v38 = vmax.f32 %v952_v37, 0.0 }
 0x414   : > { %v956_v39 = vadd.f32 1e-05, %v954_v38 }
 0x416   : > { %2160 = vrsqrt.f32 %v956_v39 }
 0x41f   : > { %v2159_v41 = vpop.eup %2158 }
 0x420   : > { %961 = vrot.lane.b32.xlu1 %v2159_v41, %s2182_s21 }
 0x423   : > { %v2161_v42 = vpop.eup %2160 }
 0x424   : > { %963 = vrot.lane.b32.xlu1 %v2161_v42, %s2182_s21 }
 0x492   : > { %v962_v44 = vpop.permute.xlu1 %961 }
 0x493   : > { %v976_v45 = vsel %vm975_vm5, %v962_v44, %v970_v43 }
 0x494   : > { %2083 = vmatprep.mubr.msk.f32.mxu1 %vm978_vm6, %v976_v45 }
 0x496   : > { %v964_v47 = vpop.permute.xlu1 %963 }
 0x497   : > { %v977_v48 = vsel %vm975_vm5, %v964_v47, %v972_v46 }
 0x498   : > { %2084 = vmatmul.mubr.msk.f32.vlgmr.msra.gmra.mxu1 %vm978_vm6, %v977_v48 }
 0x499   : > { %2094 = vmatprep.mubr.msk.bf16.mxu1 %vm2179_vm1, %v2178_v1  ;;  %2087 = vmatpush3.bf16.msra.mxu1 %v2142_v49 }
 0x49a   : > { %2088 = vmatprep.subr.bf16.mxu1 %v2178_v1 }
 0x49d   : > { %2089 = vmatpush3.bf16.msra.mxu1 %v2143_v50 }
 0x49e   : > { %2090 = vmatprep.subr.bf16.mxu1 %v2178_v1 }
 0x4a1   : > { %2091 = vmatpush3.bf16.msra.mxu1 %v2144_v51 }
 0x4a2   : > { %2092 = vmatprep.subr.bf16.mxu1 %v2178_v1 }
 0x4a5   : > { %2093 = vmatpush3.bf16.msra.mxu1 %v2145_v52 }
 0x4a6   : > { %1947 = vmatprep.subr.mxu1 %v2432_v53 }
 0x558   : > { %v2085_v54 = vpop.f32.mrf.mxu1 }
 0x559   : > { %1067 = vrot.lane.b32.xlu0 %v2085_v54, %s2180_s4 }
 0x55a   : > { %v1054_v55 = vpop.f32.mrf.mxu1 }
 0x55b   : > { %1065 = vrot.lane.b32.xlu1 %v1054_v55, %s2180_s4 }
 0x5cb   : > { %v1068_v56 = vpop.permute.xlu0 %1067 }
 0x5cc   : > { %v1072_v57 = vsub.f32 %v2392_v17, %v1068_v56  ;;  %v2528_v17 = vld [vmem:[%s2747_s16 + $0x40] sm:$0xff] }
 0x5cd   : > { %v1066_v58 = vpop.permute.xlu1 %1065 }
 0x5ce   : > { %v1074_v59 = vmul.f32 %v2085_v54, %v1072_v57  ;;  %v1071_v60 = vsub.f32 %v2390_v15, %v1066_v58  ;;  %v2516_v15 = vld [vmem:[%s2747_s16 + $0x48] sm:$0xff]  ;;  %v1125_v58 = vld [vmem:[%s2748_s17] sm:$0xff] }
 0x5cf   : > { %v1126_v57 = vld [vmem:[%s2748_s17 + $0x8] sm:$0xff] }
 0x5d0   : > { %v1073_v62 = vmul.f32 %v1071_v60, %v1054_v55  ;;  %v1082_v63 = vadd.f32 %v1882_v61, %v1074_v59  ;;  %1357 = vmatprep.subr.mxu0 %v1126_v57 }
 0x5d1   : > { %1358 = vmatpush1.msra.mxu0 %v1125_v58 }
 0x5d2   : > { %v1081_v0 = vadd.f32 %v1882_v61, %v1073_v62  ;;  %2098 = vmatprep.subr.bf16.mxu0 %v2178_v1 }
 0x5d4   : > { %v1127_v2 = vpack.c.bf16 %v1082_v63, %v1081_v0 }
 0x5d6   : > { %2095 = vmatmul.mubr.msk.bf16.vlgmr.msra.gmra.mxu1 %vm861_vm4, %v1127_v2 }
 0x5d7   : > { %1948 = vmatpush3.msra.mxu1 %v2445_v3 }
 0x5d8   : > { %1949 = vmatprep.subr.mxu1 %v2450_v4 }
 0x5d9   : > { %1950 = vmatpush3.msra.mxu1 %v2456_v5 }
 0x5da   : > { %1951 = vmatprep.subr.mxu1 %v2462_v6 }
 0x5db   : > { %1952 = vmatpush3.msra.mxu1 %v2468_v7 }
 0x5dc   : > { %1953 = vmatprep.subr.mxu1 %v2474_v8 }
 0x5dd   : > { %1954 = vmatpush3.msra.mxu1 %v2480_v9 }
 0x5de   : > { %1955 = vmatprep.subr.mxu1 %v2486_v10 }
 0x5df   : > { %1956 = vmatpush3.msra.mxu1 %v2492_v11 }
 0x5e0   : > { %1957 = vmatprep.subr.mxu1 %v2498_v12 }
 0x5e1   : > { %1958 = vmatpush3.msra.mxu1 %v2504_v13 }
 0x5e2   : > { %1959 = vmatprep.subr.mxu1 %v2510_v14 }
 0x5e3   : > { %1960 = vmatpush3.msra.mxu1 %v2516_v15 }
 0x5e4   : > { %1961 = vmatprep.subr.mxu1 %v2522_v16 }
 0x5e5   : > { %1962 = vmatpush3.msra.mxu1 %v2528_v17 }
 0x5e6   : > { %1963 = vmatprep.subr.mxu1 %v2534_v18 }
 0x5e7   : > { %1964 = vmatpush3.msra.mxu1 %v2540_v19 }
 0x5e8   : > { %1965 = vmatprep.subr.mxu1 %v2546_v20 }
 0x5e9   : > { %1966 = vmatpush3.msra.mxu1 %v2552_v21 }
 0x5ea   : > { %1967 = vmatprep.subr.mxu1 %v1114_v22 }
 0x5eb   : > { %1968 = vmatpush3.msra.mxu1 %v1098_v23 }
 0x5ec   : > { %1969 = vmatprep.subr.mxu1 %v1113_v24 }
 0x5ed   : > { %1970 = vmatpush3.msra.mxu1 %v1097_v25 }
 0x5ee   : > { %1971 = vmatprep.subr.mxu1 %v1112_v26 }
 0x5ef   : > { %1972 = vmatpush3.msra.mxu1 %v1096_v27 }
 0x5f0   : > { %1973 = vmatprep.subr.mxu1 %v1111_v28 }
 0x5f1   : > { %1974 = vmatpush3.msra.mxu1 %v1095_v29 }
 0x5f2   : > { %1975 = vmatprep.subr.mxu1 %v1110_v30 }
 0x5f3   : > { %1976 = vmatpush3.msra.mxu1 %v1094_v31 }
 0x5f4   : > { %1977 = vmatprep.subr.mxu1 %v1109_v32 }
 0x5f5   : > { %1978 = vmatpush3.msra.mxu1 %v1093_v33 }
 0x5f6   : > { %1994 = vmatprep.subr.mxu1 %v2432_v53 }
 0x696   : > { %v1195_v35 = vpop.f32.mrf.mxu1 }
 0x697   : > { %v1196_v36 = vadd.f32 %v1883_v34, %v1195_v35 }
 0x698   : > { %v2096_v37 = vpop.f32.mrf.mxu1 }
 0x699   : > { %v1202_v38 = vmul.f32 0.2, %v1196_v36 }
 0x69a   : > { %v1198_v39 = vpop.f32.mrf.mxu1 }
 0x69b   : > { %v2597_v40 = vmax.f32 %v1196_v36, %v1202_v38  ;;  %v1199_v41 = vadd.f32 %v1883_v34, %v1198_v39 }
 0x69c   : > { %v2097_v42 = vpop.f32.mrf.mxu1 }
 0x69d   : > { %v1203_v43 = vmul.f32 0.2, %v1199_v41  ;;  %v1206_v44 = vmul.f32 %v2597_v40, %v2597_v40 }
 0x69f   : > { %v2601_v45 = vmax.f32 %v1199_v41, %v1203_v43  ;;  %1272 = vmatprep.mubr.f32.mxu1 %v1206_v44 }
 0x6a0   : > { %1273 = vmatmul.mubr.f32.vlgmr.msra.gmra.mxu1 %v2597_v40 }
 0x6a1   : > { %v1207_v46 = vmul.f32 %v2601_v45, %v2601_v45  ;;  %1995 = vmatpush3.msra.mxu1 %v2445_v3 }
 0x6a2   : > { %1996 = vmatprep.subr.mxu1 %v2450_v4 }
 0x6a3   : > { %1277 = vmatprep.mubr.f32.mxu1 %v1207_v46  ;;  %1997 = vmatpush3.msra.mxu1 %v2456_v5 }
 0x6a4   : > { %1278 = vmatmul.mubr.f32.gmra.mxu1 %v2601_v45  ;;  %1998 = vmatprep.subr.mxu1 %v2462_v6 }
 0x6a5   : > { %1999 = vmatpush3.msra.mxu1 %v2468_v7  ;;  %v2146_v7 = vld [vmem:[%s2742_s11 + $0x38] sm:$0xff]  }
 0x6a6   : > { %2000 = vmatprep.subr.mxu1 %v2474_v8 }
 0x6a7   : > { %2001 = vmatpush3.msra.mxu1 %v2480_v9 }
 0x6a8   : > { %2002 = vmatprep.subr.mxu1 %v2486_v10  ;;  %v2147_v10 = vld [vmem:[%s2742_s11 + $0x30] sm:$0xff]  }
 0x6a9   : > { %2003 = vmatpush3.msra.mxu1 %v2492_v11 }
 0x6aa   : > { %2004 = vmatprep.subr.mxu1 %v2498_v12 }
 0x6ab   : > { %2005 = vmatpush3.msra.mxu1 %v2504_v13 }
 0x6ac   : > { %2006 = vmatprep.subr.mxu1 %v2510_v14  ;;  %v2148_v14 = vld [vmem:[%s2742_s11 + $0x28] sm:$0xff]  }
 0x6ad   : > { %2007 = vmatpush3.msra.mxu1 %v2516_v15  ;;  %v2149_v15 = vld [vmem:[%s2742_s11 + $0x20] sm:$0xff]  }
 0x6ae   : > { %2008 = vmatprep.subr.mxu1 %v2522_v16  ;;  %v2150_v16 = vld [vmem:[%s2742_s11 + $0x18] sm:$0xff]  }
 0x6af   : > { %2009 = vmatpush3.msra.mxu1 %v2528_v17  ;;  %v2151_v17 = vld [vmem:[%s2742_s11 + $0x10] sm:$0xff]  }
 0x6b0   : > { %2010 = vmatprep.subr.mxu1 %v2534_v18  ;;  %v2152_v18 = vld [vmem:[%s2742_s11 + $0x8] sm:$0xff]  }
 0x6b1   : > { %2011 = vmatpush3.msra.mxu1 %v2540_v19  ;;  %v2153_v19 = vld [vmem:[%s2742_s11] sm:$0xff]  }
 0x6b2   : > { %2012 = vmatprep.subr.mxu1 %v2546_v20 }
 0x6b3   : > { %2013 = vmatpush3.msra.mxu1 %v2552_v21 }
 0x6b4   : > { %2014 = vmatprep.subr.mxu1 %v1114_v22 }
 0x6b5   : > { %2015 = vmatpush3.msra.mxu1 %v1098_v23 }
 0x6b6   : > { %2016 = vmatprep.subr.mxu1 %v1113_v24 }
 0x6b7   : > { %2017 = vmatpush3.msra.mxu1 %v1097_v25 }
 0x6b8   : > { %2018 = vmatprep.subr.mxu1 %v1112_v26 }
 0x6b9   : > { %2019 = vmatpush3.msra.mxu1 %v1096_v27  ;;  %v1891_v27 = vld [vmem:[%s2741_s10] ss:$0 sm:$0xff] }
 0x6ba   : > { %2020 = vmatprep.subr.mxu1 %v1111_v28 }
 0x6bb   : > { %2021 = vmatpush3.msra.mxu1 %v1095_v29 }
 0x6bc   : > { %2022 = vmatprep.subr.mxu1 %v1110_v30 }
 0x6bd   : > { %2023 = vmatpush3.msra.mxu1 %v1094_v31 }
 0x6be   : > { %2024 = vmatprep.subr.mxu1 %v1109_v32  ;;  %v1892_v32 = vld [vmem:[%s2743_s12] ss:$0 sm:$0xff] }
 0x6bf   : > { %2025 = vmatpush3.msra.mxu1 %v1093_v33 }
 0x760   : > { %v1979_v47 = vpop.f32.mrf.mxu1 }
 0x762   : > { %v1980_v48 = vpop.f32.mrf.mxu1 }
 0x763   : > { %v1981_v49 = vadd.f32 %v1980_v48, %v1979_v47 }
 0x764   : > { %v1982_v50 = vpop.f32.mrf.mxu1 }
 0x765   : > { %v1283_v51 = vmul.f32 0.03125, %v1981_v49 }
 0x766   : > { %v1983_v52 = vpop.f32.mrf.mxu1 }
 0x767   : > { %v1984_v53 = vadd.f32 %v1983_v52, %v1982_v50  ;;  %v1285_v54 = vmul.f32 %v1283_v51, %v1283_v51 }
 0x769   : > { %v1284_v55 = vmul.f32 0.03125, %v1984_v53  ;;  %1289 = vrot.lane.b32.xlu1 %v1285_v54, %s2183_s26 }
 0x76b   : > { %v1286_v56 = vmul.f32 %v1284_v55, %v1284_v55 }
 0x76d   : > { %1291 = vrot.lane.b32.xlu0 %v1286_v56, %s2183_s26 }
 0x771   : > { %1313 = vrot.lane.b32.xlu0 %v1283_v51, %s2183_s26 }
 0x775   : > { %1315 = vrot.lane.b32.xlu0 %v1284_v55, %s2183_s26 }
 0x7db   : > { %v1290_v59 = vpop.permute.xlu1 %1289 }
 0x7dc   : > { %v1295_v60 = vsub.f32 %v1283_v51, %v1290_v59 }
 0x7de   : > { %v1297_v61 = vmax.f32 %v1295_v60, 0.0 }
 0x7df   : > { %v1292_v62 = vpop.permute.xlu0 %1291 }
 0x7e0   : > { %v1299_v63 = vadd.f32 1e-05, %v1297_v61  ;;  %v1296_v0 = vsub.f32 %v1284_v55, %v1292_v62  ;;  %v1435_v61 = vld [vmem:[%s2749_s18 + $0x8] sm:$0xff]  ;;  %v1434_v62 = vld [vmem:[%s2749_s18] sm:$0xff] }
 0x7e1   : > { %2118 = vmatprep.subr.mxu1 %v1435_v61 }
 0x7e2   : > { %2162 = vrsqrt.f32 %v1299_v63  ;;  %v1298_v2 = vmax.f32 %v1296_v0, 0.0 }
 0x7e3   : > { %v1314_v6 = vpop.permute.xlu0 %1313 }
 0x7e4   : > { %v1300_v3 = vadd.f32 1e-05, %v1298_v2 }
 0x7e6   : > { %2164 = vrsqrt.f32 %v1300_v3 }
 0x7e7   : > { %v1316_v11 = vpop.permute.xlu0 %1315 }
 0x7ef   : > { %v2163_v4 = vpop.eup %2162 }
 0x7f0   : > { %1305 = vrot.lane.b32.xlu1 %v2163_v4, %s2184_s0 }
 0x7f3   : > { %v2165_v5 = vpop.eup %2164 }
 0x7f4   : > { %1307 = vrot.lane.b32.xlu1 %v2165_v5, %s2184_s0 }
 0x862   : > { %v1306_v8 = vpop.permute.xlu1 %1305 }
 0x863   : > { %v1319_v9 = vsel %vm978_vm6, %v1306_v8, %v1314_v6 }
 0x864   : > { %1889 = vmatmul.mubr.msk.f32.vlgmr.msra.gmra.mxu0 %vm656_vm2, %v1319_v9  ;;  %v1756_v9 = vlaneseq }
 0x865   : > { %1397 = vmatprep.mubr.f32.mxu0 %v2178_v1  ;;  %2099 = vmatpush3.bf16.msra.mxu0 %v2146_v7 }
 0x866   : > { %v1308_v12 = vpop.permute.xlu1 %1307  ;;  %2100 = vmatprep.subr.bf16.mxu0 %v2178_v1 }
 0x867   : > { %v1320_v13 = vsel %vm978_vm6, %v1308_v12, %v1316_v11  ;;  %v1757_v11 = vshrl.u32 %v1756_v9, 7 }
 0x868   : > { %1890 = vmatmul.mubr.msk.f32.gmra.mxu0 %vm656_vm2, %v1320_v13 }
 0x869   : > { %2101 = vmatpush3.bf16.msra.mxu0 %v2147_v10  ;;  %2114 = vmatprep.mubr.msk.bf16.mxu0 %vm2179_vm1, %v2178_v1  ;;  %v1758_v13 = vadd.s32 8, %v1757_v11 }
 0x86a   : > { %2102 = vmatprep.subr.bf16.mxu0 %v2178_v1 }
 0x86d   : > { %2103 = vmatpush3.bf16.msra.mxu0 %v2148_v14 }
 0x86e   : > { %2104 = vmatprep.subr.bf16.mxu0 %v2178_v1 }
 0x871   : > { %2105 = vmatpush3.bf16.msra.mxu0 %v2149_v15  ;;  %v1759_v15 = vstv %s1906_s28 }
 0x872   : > { %2106 = vmatprep.subr.bf16.mxu0 %v2178_v1 }
 0x875   : > { %2107 = vmatpush3.bf16.msra.mxu0 %v2150_v16 }
 0x876   : > { %2108 = vmatprep.subr.bf16.mxu0 %v2178_v1 }
 0x879   : > { %2109 = vmatpush3.bf16.msra.mxu0 %v2151_v17 }
 0x87a   : > { %2110 = vmatprep.subr.bf16.mxu0 %v2178_v1 }
 0x87d   : > { %2111 = vmatpush3.bf16.msra.mxu0 %v2152_v18  ;;  %v1903_v18 = vld [vmem:[%s2744_s13] ss:$0 sm:$0xff] }
 0x87e   : > { %2112 = vmatprep.subr.bf16.mxu0 %v2178_v1 }
 0x881   : > { %2113 = vmatpush3.bf16.msra.mxu0 %v2153_v19  ;;  %v1760_v19 = vadd.s32 %v1759_v15, %v1757_v11 }
 0x882   : > { %1687 = vmatprep.subr.mxu0 %v1435_v61 }
 0x883   : > { %vm1762_vm7 = vcmp.lt.s32.totalorder %v1760_v19, 40 }
 0x924   : > { %v1393_v20 = vpop.f32.mrf.mxu0 }
 0x926   : > { %v1395_v21 = vpop.f32.mrf.mxu0 }
 0x927   : > { %v1404_v22 = vsub.f32 %v2597_v40, %v1395_v21  ;;  %v1761_v21 = vadd.s32 %v1759_v15, %v1758_v13 }
 0x928   : > { %v1399_v23 = vpop.f32.mrf.mxu0 }
 0x929   : > { %v1406_v25 = vmul.f32 %v1404_v22, %v1393_v20  ;;  %vm1763_vm8 = vcmp.lt.s32.totalorder %v1761_v21, 40 }
 0x92a   : > { %v1401_v24 = vpop.f32.mrf.mxu0 }
 0x92b   : > { %v1405_v26 = vsub.f32 %v2601_v45, %v1401_v24  ;;  %v1414_v29 = vadd.f32 %v1891_v27, %v1406_v25 }
 0x92d   : > { %v1407_v28 = vmul.f32 %v1405_v26, %v1399_v23 }
 0x92f   : > { %v1415_v30 = vadd.f32 %v1891_v27, %v1407_v28 }
 0x931   : > { %v1436_v31 = vpack.c.bf16 %v1415_v30, %v1414_v29 }
 0x933   : > { %1915 = vst [vmem:[%s638_s23] sm:$0xff] %v1436_v31   ;;  %2115 = vmatmul.mubr.bf16.vlgmr.msra.gmra.mxu0 %v1436_v31  ;;  %s643_s23 = scalar_lea.vmem %s2751_s20, %s1870_s29 }
 0x934   : > { %1721 = vmatprep.mubr.f32.mxu0 %v2178_v1  ;;  %1688 = vmatpush1.msra.mxu0 %v1434_v62 }
 0x9f3   : > { %v1525_v33 = vpop.f32.mrf.mxu0 }
 0x9f4   : > { %v1526_v34 = vadd.f32 %v1892_v32, %v1525_v33 }
 0x9f5   : > { %v2116_v35 = vpop.f32.mrf.mxu0 }
 0x9f6   : > { %v1532_v36 = vmul.f32 0.2, %v1526_v34 }
 0x9f7   : > { %v1528_v37 = vpop.f32.mrf.mxu0 }
 0x9f8   : > { %v2690_v38 = vmax.f32 %v1526_v34, %v1532_v36  ;;  %v1529_v39 = vadd.f32 %v1892_v32, %v1528_v37 }
 0x9f9   : > { %v2117_v40 = vpop.f32.mrf.mxu0 }
 0x9fa   : > { %v1533_v41 = vmul.f32 0.2, %v1529_v39  ;;  %v1536_v42 = vmul.f32 %v2690_v38, %v2690_v38 }
 0x9fc   : > { %v2694_v43 = vmax.f32 %v1529_v39, %v1533_v41  ;;  %1602 = vmatprep.mubr.f32.mxu1 %v1536_v42 }
 0x9fd   : > { %1603 = vmatmul.mubr.f32.vlgmr.msra.gmra.mxu1 %v2690_v38 }
 0x9fe   : > { %v1537_v44 = vmul.f32 %v2694_v43, %v2694_v43  ;;  %2119 = vmatpush1.msra.mxu1 %v1434_v62 }
 0xa00   : > { %1607 = vmatprep.mubr.f32.mxu1 %v1537_v44 }
 0xa01   : > { %1608 = vmatmul.mubr.f32.gmra.mxu1 %v2694_v43 }
 0xa02   : > { %1727 = vmatprep.mubr.f32.mxu1 %v2178_v1 }
 0xabd   : > { %v2026_v45 = vpop.f32.mrf.mxu1 }
 0xabf   : > { %v2027_v46 = vpop.f32.mrf.mxu1 }
 0xac0   : > { %v2028_v47 = vadd.f32 %v2027_v46, %v2026_v45 }
 0xac1   : > { %v2029_v48 = vpop.f32.mrf.mxu1 }
 0xac2   : > { %v1613_v49 = vmul.f32 0.03125, %v2028_v47 }
 0xac3   : > { %v2030_v50 = vpop.f32.mrf.mxu1 }
 0xac4   : > { %v2031_v51 = vadd.f32 %v2030_v50, %v2029_v48  ;;  %v1615_v52 = vmul.f32 %v1613_v49, %v1613_v49 }
 0xac6   : > { %v1614_v53 = vmul.f32 0.03125, %v2031_v51  ;;  %1619 = vrot.lane.b32.xlu1 %v1615_v52, %s2183_s26 }
 0xac8   : > { %v1616_v54 = vmul.f32 %v1614_v53, %v1614_v53 }
 0xaca   : > { %1621 = vrot.lane.b32.xlu0 %v1616_v54, %s2183_s26 }
 0xb38   : > { %v1620_v55 = vpop.permute.xlu1 %1619 }
 0xb39   : > { %v1625_v56 = vsub.f32 %v1613_v49, %v1620_v55 }
 0xb3b   : > { %v1627_v57 = vmax.f32 %v1625_v56, 0.0 }
 0xb3c   : > { %v1622_v58 = vpop.permute.xlu0 %1621 }
 0xb3d   : > { %v1629_v59 = vadd.f32 1e-05, %v1627_v57  ;;  %v1626_v1 = vsub.f32 %v1614_v53, %v1622_v58 }
 0xb3f   : > { %2166 = vrsqrt.f32 %v1629_v59  ;;  %v1628_v60 = vmax.f32 %v1626_v1, 0.0 }
 0xb41   : > { %v1630_v63 = vadd.f32 1e-05, %v1628_v60 }
 0xb43   : > { %2168 = vrsqrt.f32 %v1630_v63 }
 0xb4c   : > { %v2167_v0 = vpop.eup %2166 }
 0xb4d   : > { %1635 = vrot.lane.b32.xlu1 %v2167_v0, %s2184_s0 }
 0xb50   : > { %v2169_v2 = vpop.eup %2168 }
 0xb51   : > { %1643 = vrot.lane.b32.xlu1 %v1613_v49, %s2183_s26  ;;  %1637 = vrot.lane.b32.xlu0 %v2169_v2, %s2184_s0 }
 0xb55   : > { %1645 = vrot.lane.b32.xlu0 %v1614_v53, %s2183_s26 }
 0xbbf   : > { %v1636_v3 = vpop.permute.xlu1 %1635 }
 0xbc3   : > { %v1644_v4 = vpop.permute.xlu1 %1643  ;;  %v1638_v5 = vpop.permute.xlu0 %1637 }
 0xbc4   : > { %v1649_v6 = vsel %vm978_vm6, %v1636_v3, %v1644_v4 }
 0xbc5   : > { %1901 = vmatmul.mubr.msk.f32.vlgmr.msra.gmra.mxu0 %vm656_vm2, %v1649_v6 }
 0xbc7   : > { %v1646_v7 = vpop.permute.xlu0 %1645 }
 0xbc8   : > { %v1650_v8 = vsel %vm978_vm6, %v1638_v5, %v1646_v7 }
 0xbc9   : > { %1902 = vmatmul.mubr.msk.f32.vlgmr.msra.gmra.mxu1 %vm656_vm2, %v1650_v8 }
 0xc85   : > { %v1723_v10 = vpop.f32.mrf.mxu0 }
 0xc87   : > { %v1725_v12 = vpop.f32.mrf.mxu0 }
 0xc88   : > { %v1734_v14 = vsub.f32 %v2690_v38, %v1725_v12 }
 0xc89   : > { %v1729_v16 = vpop.f32.mrf.mxu1 }
 0xc8a   : > { %v1736_v17 = vmul.f32 %v1734_v14, %v1723_v10 }
 0xc8b   : > { %v1731_v20 = vpop.f32.mrf.mxu1 }
 0xc8c   : > { %v1735_v22 = vsub.f32 %v2694_v43, %v1731_v20  ;;  %v1744_v23 = vadd.f32 %v1903_v18, %v1736_v17 }
 0xc8e   : > { %v1737_v24 = vmul.f32 %v1735_v22, %v1729_v16  ;;  %v1764_v26 = vsel %vm1762_vm7, %v1744_v23, -inf }
 0xc90   : > { %v1745_v25 = vadd.f32 %v1903_v18, %v1737_v24 }
 0xc92   : > { %v1765_v27 = vsel %vm1763_vm8, %v1745_v25, -inf }
 0xc93   : > { %v1766_v28 = vmax.f32 %v1764_v26, %v1765_v27 }
 0xc95   : > { %v1767_v29 = vrot.slane %v1766_v28, 4 }
 0xc97   : > { %v1768_v30 = vmax.f32 %v1766_v28, %v1767_v29 }
 0xc99   : > { %v1769_v31 = vrot.slane %v1768_v30, 2 }
 0xc9b   : > { %v1770_v32 = vmax.f32 %v1768_v30, %v1769_v31 }
 0xc9d   : > { %v1771_v33 = vrot.slane %v1770_v32, 1 }
 0xc9f   : > { %v1772_v34 = vmax.f32 %v1770_v32, %v1771_v33 }
 0xca1   : > { %1773 = vst [vmem:[%s643_s23] sm:$0xff] %v1772_v34 }
 0xca2 PF: > { %s31_s1 = sadd.s32 1, %s2176_s1  }
 0xca3   : > { %p28_p5 = scmp.ge.s32.totalorder %s31_s1, 5  }
 0xca5   :  { %30 = sbr.rel (!%p28_p5) target bundleno = 6 (0x6), region = 138 }

</bundles_post_ra>
